<compile_context>
chip_gen: v7x
topology: tpu7x:2x2x1
jax: 0.10.0
libtpu: 0.0.40
codegen_flags: <defaults>
</compile_context>

<pallas_src>
import math
import jax
import jax.numpy as jnp
from jax.experimental import pallas as pl
from jax.experimental.pallas import tpu as pltpu

# ----------------------------- model dims -----------------------------------
B = 2          # batch
S_TGT = 8      # target sequence length
S_SRC = 16     # source (memory) sequence length
D_MODEL = 32   # model width
H = 4          # attention heads
D_K = D_MODEL // H
D_FF = 64      # feed-forward hidden width
EPS = 1e-6
SCALE = 1.0 / math.sqrt(D_K)
LANE = 128     # TPU lane width; every packed operand gets its own 128-lane block

# packed-slab layouts: (name, used_width); each entry occupies one 128-lane block
_VEC_LAYOUT = (
    ("ln0_a", D_MODEL), ("ln0_b", D_MODEL), ("bqkv0", 3 * D_MODEL), ("bo0", D_MODEL),
    ("ln1_a", D_MODEL), ("ln1_b", D_MODEL), ("bq1", D_MODEL), ("bkv1", 2 * D_MODEL),
    ("bo1", D_MODEL), ("ln2_a", D_MODEL), ("ln2_b", D_MODEL),
    ("ff_b1", D_FF), ("ff_b2", D_MODEL))
_VEC_IDX = {name: i for i, (name, _) in enumerate(_VEC_LAYOUT)}

_WMAT_LAYOUT = (
    ("wqkv0", 3 * D_MODEL), ("wo0", D_MODEL), ("wq1", D_MODEL),
    ("wkv1", 2 * D_MODEL), ("wo1", D_MODEL), ("ff_w1", D_FF))
_WMAT_IDX = {name: i for i, (name, _) in enumerate(_WMAT_LAYOUT)}


# ----------------------------- fused kernel ---------------------------------
def decoder_layer_kernel(act_ref, tbias_ref, sbias_ref,
                         wmat_ref, w2_ref, vec_ref, o_ref):
    """Entire DecoderLayer forward on VMEM-resident data (single program)."""
    nt = B * S_TGT
    x = act_ref[0:nt, :]                     # (B*S_tgt, D)  f32
    mem = act_ref[nt:nt + B * S_SRC, :]      # (B*S_src, D)  f32

    def vparam(name):                        # (1, width) f32, 128-lane aligned
        i = _VEC_IDX[name]
        return vec_ref[:, i * LANE:i * LANE + _VEC_LAYOUT[i][1]]

    def wparam(name):                        # (D, width) bf16, 128-lane aligned
        i = _WMAT_IDX[name]
        return wmat_ref[:, i * LANE:i * LANE + _WMAT_LAYOUT[i][1]]

    tbias = tbias_ref[...]                   # (1, St, St)   additive mask bias
    sbias = sbias_ref[...]                   # (H*B, 1, Ss)  additive mask bias

    def layernorm(v, a, b):
        # Annotated-Transformer LayerNorm: a*(x-mean)/(std_unbiased+eps)+b
        mean = jnp.mean(v, axis=-1, keepdims=True)
        var = jnp.sum((v - mean) ** 2, axis=-1, keepdims=True) / (D_MODEL - 1)
        return a * (v - mean) / (jnp.sqrt(var) + EPS) + b

    def proj(v, w_bf16, bias_f32):
        # bf16 x bf16 MXU matmul with f32 accumulation, f32 bias add.
        return jnp.dot(v.astype(jnp.bfloat16), w_bf16,
                       preferred_element_type=jnp.float32) + bias_f32

    def split_heads(t2d, s):
        # (B*s, H*D_k) -> (H*B, s, D_k); batch index = h*B + b.
        t3 = t2d.reshape(B, s, D_MODEL)          # leading row-group split (free)
        return jnp.concatenate(
            [t3[:, :, h * D_K:(h + 1) * D_K] for h in range(H)], axis=0)

    def merge_heads(o, sq):
        # (H*B, sq, D_k) -> (B*sq, H*D_k)
        parts = [o[h * B:(h + 1) * B] for h in range(H)]
        return jnp.concatenate(parts, axis=-1).reshape(B * sq, D_MODEL)

    def attention(q2d, k2d, v2d, bias, sq, sk):
        q = split_heads(q2d.astype(jnp.bfloat16), sq)
        k = split_heads(k2d.astype(jnp.bfloat16), sk)
        v = split_heads(v2d.astype(jnp.bfloat16), sk)
        s = jnp.einsum("bqd,bkd->bqk", q, k,
                       preferred_element_type=jnp.float32)
        s = s * SCALE + bias                     # bias broadcast over (H*B) heads
        s = s - jnp.max(s, axis=-1, keepdims=True)
        p = jnp.exp(s)
        p = p * pl.reciprocal(jnp.sum(p, axis=-1, keepdims=True), approx=True)
        o = jnp.einsum("bqk,bkd->bqd", p.astype(jnp.bfloat16), v,
                       preferred_element_type=jnp.float32)
        return merge_heads(o, sq)

    # ---- sublayer 0: pre-LN self-attention + residual -----------------------
    xn = layernorm(x, vparam("ln0_a"), vparam("ln0_b"))
    qkv = proj(xn, wparam("wqkv0"), vparam("bqkv0"))
    attn = attention(qkv[:, :D_MODEL], qkv[:, D_MODEL:2 * D_MODEL],
                     qkv[:, 2 * D_MODEL:], tbias, S_TGT, S_TGT)
    x = x + proj(attn, wparam("wo0"), vparam("bo0"))

    # ---- sublayer 1: pre-LN source attention + residual ----------------------
    xn = layernorm(x, vparam("ln1_a"), vparam("ln1_b"))
    q1 = proj(xn, wparam("wq1"), vparam("bq1"))
    kv = proj(mem, wparam("wkv1"), vparam("bkv1"))
    attn = attention(q1, kv[:, :D_MODEL], kv[:, D_MODEL:], sbias, S_TGT, S_SRC)
    x = x + proj(attn, wparam("wo1"), vparam("bo1"))

    # ---- sublayer 2: pre-LN feed-forward + residual ---------------------------
    xn = layernorm(x, vparam("ln2_a"), vparam("ln2_b"))
    hdn = jnp.maximum(proj(xn, wparam("ff_w1"), vparam("ff_b1")), 0.0)
    x = x + proj(hdn, w2_ref[...], vparam("ff_b2"))

    # ---- lane-dense store: (B*S_tgt, D) -> (B, S_tgt*D) ----------------------
    # Built with row slices + lane concat (guaranteed-lowering relayout).
    x3 = x.reshape(B, S_TGT, D_MODEL)
    out = jnp.concatenate([x3[:, s:s + 1, :] for s in range(S_TGT)], axis=-1)
    o_ref[...] = out.reshape(B, S_TGT * D_MODEL).astype(o_ref.dtype)


# ----------------------------- pallas_call wrapper ---------------------------
def _full_spec(shape):
    nd = len(shape)
    return pl.BlockSpec(shape, lambda i, _nd=nd: (0,) * _nd)


def pack_params(p):
    """Pack all weights/biases/LN params into 3 contiguous, lane-aligned slabs."""
    def vrow(v):   # (n,) -> (1, 128) zero-padded
        return jnp.pad(v, (0, LANE - v.shape[0])).reshape(1, LANE)

    def wblk(w):   # (D, c) -> (D, 128) zero-padded
        return jnp.pad(w, ((0, 0), (0, LANE - w.shape[1])))

    sa, ca = p["self_attn"], p["src_attn"]
    named_w = dict(wqkv0=sa["wqkv"], wo0=sa["wo"], wq1=ca["wq"],
                   wkv1=ca["wkv"], wo1=ca["wo"], ff_w1=p["ff_w1"])
    named_v = dict(ln0_a=p["ln0_a"], ln0_b=p["ln0_b"], bqkv0=sa["bqkv"],
                   bo0=sa["bo"], ln1_a=p["ln1_a"], ln1_b=p["ln1_b"],
                   bq1=ca["bq"], bkv1=ca["bkv"], bo1=ca["bo"],
                   ln2_a=p["ln2_a"], ln2_b=p["ln2_b"],
                   ff_b1=p["ff_b1"], ff_b2=p["ff_b2"])
    wmat = jnp.concatenate([wblk(named_w[n]) for n, _ in _WMAT_LAYOUT],
                           axis=1).astype(jnp.bfloat16)           # (32, 6*128)
    vec = jnp.concatenate([vrow(named_v[n]) for n, _ in _VEC_LAYOUT],
                          axis=1).astype(jnp.float32)             # (1, 13*128)
    w2 = p["ff_w2"].astype(jnp.bfloat16)                          # (64, 32)
    return dict(wmat=wmat, w2=w2, vec=vec)


def decoder_layer_forward(x, memory, src_mask, tgt_mask, packed):
    """x: (B, S_tgt, D), memory: (B, S_src, D),
       src_mask: (B, 1, S_src), tgt_mask: (1, S_tgt, S_tgt)."""
    b, st, d = x.shape
    ss = memory.shape[1]

    # one activation slab (x rows then memory rows)
    act = jnp.concatenate([x.reshape(b * st, d), memory.reshape(b * ss, d)],
                          axis=0).astype(jnp.float32)

    # host-precomputed additive mask biases (masked_fill(mask == 0, -1e9))
    tbias = jnp.where(tgt_mask == 0, -1e9, 0.0).astype(jnp.float32)  # (1, St, St)
    sbias = jnp.where(src_mask == 0, -1e9, 0.0).astype(jnp.float32)  # (B, 1, Ss)
    sbias = jnp.tile(sbias, (H, 1, 1))                               # (H*B, 1, Ss)

    args = (act, tbias, sbias, packed["wmat"], packed["w2"], packed["vec"])
    out = pl.pallas_call(
        decoder_layer_kernel,
        out_shape=jax.ShapeDtypeStruct((b, st * d), jnp.float32),   # lane-dense
        grid=(1,),
        in_specs=[_full_spec(a.shape) for a in args],
        out_specs=_full_spec((b, st * d)),
        compiler_params=pltpu.CompilerParams(
            dimension_semantics=("arbitrary",)),
    )(*args)
    return out.reshape(b, st, d)


# ----------------------------- parameter init --------------------------------
def init_params(key):
    def dense(k, din, dout):
        kw, kb = jax.random.split(k)
        w = jax.random.normal(kw, (din, dout), jnp.float32) / jnp.sqrt(
            jnp.float32(din))
        bias = jax.random.normal(kb, (dout,), jnp.float32) * 0.01
        return w, bias

    keys = jax.random.split(key, 10)

    # self-attention: fused Q|K|V projection, separate output projection
    wq, bq = dense(keys[0], D_MODEL, D_MODEL)
    wk, bk = dense(keys[1], D_MODEL, D_MODEL)
    wv, bv = dense(keys[2], D_MODEL, D_MODEL)
    wo0, bo0 = dense(keys[3], D_MODEL, D_MODEL)
    self_attn = dict(
        wqkv=jnp.concatenate([wq, wk, wv], axis=1),      # (D, 3D)
        bqkv=jnp.concatenate([bq, bk, bv]),              # (3D,)
        wo=wo0, bo=bo0)

    # source attention: Q from x, fused K|V from memory
    wq1, bq1 = dense(keys[4], D_MODEL, D_MODEL)
    wk1, bk1 = dense(keys[5], D_MODEL, D_MODEL)
    wv1, bv1 = dense(keys[6], D_MODEL, D_MODEL)
    wo1, bo1 = dense(keys[7], D_MODEL, D_MODEL)
    src_attn = dict(
        wq=wq1, bq=bq1,
        wkv=jnp.concatenate([wk1, wv1], axis=1),         # (D, 2D)
        bkv=jnp.concatenate([bk1, bv1]),                 # (2D,)
        wo=wo1, bo=bo1)

    w1, b1 = dense(keys[8], D_MODEL, D_FF)
    w2, b2 = dense(keys[9], D_FF, D_MODEL)

    return dict(
        self_attn=self_attn, src_attn=src_attn,
        ff_w1=w1, ff_b1=b1, ff_w2=w2, ff_b2=b2,
        ln0_a=jnp.ones((D_MODEL,), jnp.float32),
        ln0_b=jnp.zeros((D_MODEL,), jnp.float32),
        ln1_a=jnp.ones((D_MODEL,), jnp.float32),
        ln1_b=jnp.zeros((D_MODEL,), jnp.float32),
        ln2_a=jnp.ones((D_MODEL,), jnp.float32),
        ln2_b=jnp.zeros((D_MODEL,), jnp.float32),
    )


# ----------------------------- main -------------------------------------------
if __name__ == "__main__":
    key = jax.random.PRNGKey(0)
    k_x, k_m, k_p = jax.random.split(key, 3)

    x = jax.random.normal(k_x, (B, S_TGT, D_MODEL), jnp.float32)
    memory = jax.random.normal(k_m, (B, S_SRC, D_MODEL), jnp.float32)

    # causal target mask (1, S_tgt, S_tgt); all-ones source mask (B, 1, S_src)
    tgt_mask = jnp.tril(jnp.ones((S_TGT, S_TGT), jnp.float32))[None, :, :]
    src_mask = jnp.ones((B, 1, S_SRC), jnp.float32)

    params = init_params(k_p)
    packed = pack_params(params)

    out = decoder_layer_forward(x, memory, src_mask, tgt_mask, packed)
    out = jax.block_until_ready(out)
    assert out.shape == (B, S_TGT, D_MODEL)
    assert bool(jnp.all(jnp.isfinite(out)))
    print("KERNEL_OK")
</pallas_src>

<mosaic_0001>
module attributes {stable_mosaic.version = 11 : i64} {
  func.func @decoder_layer_kernel(%arg0: i32, %arg1: memref<48x32xf32, #tpu.memory_space<vmem>>, %arg2: memref<1x8x8xf32, #tpu.memory_space<vmem>>, %arg3: memref<8x1x16xf32, #tpu.memory_space<vmem>>, %arg4: memref<32x768xbf16, #tpu.memory_space<vmem>>, %arg5: memref<64x32xbf16, #tpu.memory_space<vmem>>, %arg6: memref<1x1664xf32, #tpu.memory_space<vmem>>, %arg7: memref<2x256xf32, #tpu.memory_space<vmem>>) attributes {dimension_semantics = [#tpu.dimension_semantics<arbitrary>], iteration_bounds = array<i64: 1>, scalar_prefetch = 0 : i64, scratch_operands = 0 : i64, tpu.core_type = #tpu.core_type<tc>, window_params = [{pipeline_mode = #tpu.pipeline_mode<synchronous>, transform_indices = @transform_0, window_bounds = array<i64: 48, 32>}, {pipeline_mode = #tpu.pipeline_mode<synchronous>, transform_indices = @transform_1, window_bounds = array<i64: 1, 8, 8>}, {pipeline_mode = #tpu.pipeline_mode<synchronous>, transform_indices = @transform_2, window_bounds = array<i64: 8, 1, 16>}, {pipeline_mode = #tpu.pipeline_mode<synchronous>, transform_indices = @transform_3, window_bounds = array<i64: 32, 768>}, {pipeline_mode = #tpu.pipeline_mode<synchronous>, transform_indices = @transform_4, window_bounds = array<i64: 64, 32>}, {pipeline_mode = #tpu.pipeline_mode<synchronous>, transform_indices = @transform_5, window_bounds = array<i64: 1, 1664>}, {pipeline_mode = #tpu.pipeline_mode<synchronous>, transform_indices = @transform_6, window_bounds = array<i64: 2, 256>}]} {
    %c0 = arith.constant 0 : index
    %c0_0 = arith.constant 0 : index
    %0 = vector.load %arg1[%c0, %c0_0] : memref<48x32xf32, #tpu.memory_space<vmem>>, vector<16x32xf32>
    %c16 = arith.constant 16 : index
    %c0_1 = arith.constant 0 : index
    %1 = vector.load %arg1[%c16, %c0_1] : memref<48x32xf32, #tpu.memory_space<vmem>>, vector<32x32xf32>
    %c0_2 = arith.constant 0 : index
    %c0_3 = arith.constant 0 : index
    %c0_4 = arith.constant 0 : index
    %2 = vector.load %arg2[%c0_2, %c0_3, %c0_4] : memref<1x8x8xf32, #tpu.memory_space<vmem>>, vector<1x8x8xf32>
    %c0_5 = arith.constant 0 : index
    %c0_6 = arith.constant 0 : index
    %c0_7 = arith.constant 0 : index
    %3 = vector.load %arg3[%c0_5, %c0_6, %c0_7] : memref<8x1x16xf32, #tpu.memory_space<vmem>>, vector<8x1x16xf32>
    %c0_8 = arith.constant 0 : index
    %c0_9 = arith.constant 0 : index
    %4 = vector.load %arg6[%c0_8, %c0_9] : memref<1x1664xf32, #tpu.memory_space<vmem>>, vector<1x32xf32>
    %c0_10 = arith.constant 0 : index
    %c128 = arith.constant 128 : index
    %5 = vector.load %arg6[%c0_10, %c128] : memref<1x1664xf32, #tpu.memory_space<vmem>>, vector<1x32xf32>
    %cst = arith.constant dense<0.000000e+00> : vector<16xf32>
    %6 = vector.multi_reduction <add>, %0, %cst [1] : vector<16x32xf32> to vector<16xf32>
    %7 = vector.shape_cast %6 : vector<16xf32> to vector<16x1xf32>
    %cst_11 = arith.constant 3.200000e+01 : f32
    %8 = vector.broadcast %cst_11 : f32 to vector<16x1xf32>
    %9 = arith.divf %7, %8 : vector<16x1xf32>
    %10 = vector.broadcast %9 : vector<16x1xf32> to vector<16x32xf32>
    %11 = arith.subf %0, %10 : vector<16x32xf32>
    %12 = arith.mulf %11, %11 : vector<16x32xf32>
    %cst_12 = arith.constant dense<0.000000e+00> : vector<16xf32>
    %13 = vector.multi_reduction <add>, %12, %cst_12 [1] : vector<16x32xf32> to vector<16xf32>
    %14 = vector.shape_cast %13 : vector<16xf32> to vector<16x1xf32>
    %cst_13 = arith.constant 3.100000e+01 : f32
    %15 = vector.broadcast %cst_13 : f32 to vector<16x1xf32>
    %16 = arith.divf %14, %15 : vector<16x1xf32>
    %17 = vector.broadcast %9 : vector<16x1xf32> to vector<16x32xf32>
    %18 = arith.subf %0, %17 : vector<16x32xf32>
    %19 = vector.broadcast %4 : vector<1x32xf32> to vector<16x32xf32>
    %20 = arith.mulf %19, %18 : vector<16x32xf32>
    %21 = math.sqrt %16 : vector<16x1xf32>
    %cst_14 = arith.constant 9.99999997E-7 : f32
    %22 = vector.broadcast %cst_14 : f32 to vector<16x1xf32>
    %23 = arith.addf %21, %22 : vector<16x1xf32>
    %24 = vector.broadcast %23 : vector<16x1xf32> to vector<16x32xf32>
    %25 = arith.divf %20, %24 : vector<16x32xf32>
    %26 = vector.broadcast %5 : vector<1x32xf32> to vector<16x32xf32>
    %27 = arith.addf %25, %26 : vector<16x32xf32>
    %c0_15 = arith.constant 0 : index
    %c0_16 = arith.constant 0 : index
    %28 = vector.load %arg4[%c0_15, %c0_16] : memref<32x768xbf16, #tpu.memory_space<vmem>>, vector<32x96xbf16>
    %c0_17 = arith.constant 0 : index
    %c256 = arith.constant 256 : index
    %29 = vector.load %arg6[%c0_17, %c256] : memref<1x1664xf32, #tpu.memory_space<vmem>>, vector<1x96xf32>
    %30 = arith.truncf %27 : vector<16x32xf32> to vector<16x32xbf16>
    %cst_18 = arith.constant dense<0.000000e+00> : vector<16x96xf32>
    %31 = tpu.matmul %30, %28, %cst_18 {dimension_numbers = #tpu.dot_dimension_numbers<[1], [0], [0], [1], [0, 0, 1, 1], [], []>} : vector<16x32xbf16>, vector<32x96xbf16>, vector<16x96xf32> -> vector<16x96xf32>
    %32 = vector.broadcast %29 : vector<1x96xf32> to vector<16x96xf32>
    %33 = arith.addf %31, %32 : vector<16x96xf32>
    %34 = vector.extract_strided_slice %33 {offsets = [0, 0], sizes = [16, 32], strides = [1, 1]} : vector<16x96xf32> to vector<16x32xf32>
    %35 = vector.extract_strided_slice %33 {offsets = [0, 32], sizes = [16, 32], strides = [1, 1]} : vector<16x96xf32> to vector<16x32xf32>
    %36 = vector.extract_strided_slice %33 {offsets = [0, 64], sizes = [16, 32], strides = [1, 1]} : vector<16x96xf32> to vector<16x32xf32>
    %37 = arith.truncf %34 : vector<16x32xf32> to vector<16x32xbf16>
    %38 = vector.shape_cast %37 : vector<16x32xbf16> to vector<2x8x32xbf16>
    %39 = vector.extract_strided_slice %38 {offsets = [0, 0, 0], sizes = [2, 8, 8], strides = [1, 1, 1]} : vector<2x8x32xbf16> to vector<2x8x8xbf16>
    %40 = vector.extract_strided_slice %38 {offsets = [0, 0, 8], sizes = [2, 8, 8], strides = [1, 1, 1]} : vector<2x8x32xbf16> to vector<2x8x8xbf16>
    %41 = vector.extract_strided_slice %38 {offsets = [0, 0, 16], sizes = [2, 8, 8], strides = [1, 1, 1]} : vector<2x8x32xbf16> to vector<2x8x8xbf16>
    %42 = vector.extract_strided_slice %38 {offsets = [0, 0, 24], sizes = [2, 8, 8], strides = [1, 1, 1]} : vector<2x8x32xbf16> to vector<2x8x8xbf16>
    %43 = tpu.concatenate %39, %40, %41, %42 in 0 : vector<2x8x8xbf16>, vector<2x8x8xbf16>, vector<2x8x8xbf16>, vector<2x8x8xbf16> -> vector<8x8x8xbf16>
    %44 = arith.truncf %35 : vector<16x32xf32> to vector<16x32xbf16>
    %45 = vector.shape_cast %44 : vector<16x32xbf16> to vector<2x8x32xbf16>
    %46 = vector.extract_strided_slice %45 {offsets = [0, 0, 0], sizes = [2, 8, 8], strides = [1, 1, 1]} : vector<2x8x32xbf16> to vector<2x8x8xbf16>
    %47 = vector.extract_strided_slice %45 {offsets = [0, 0, 8], sizes = [2, 8, 8], strides = [1, 1, 1]} : vector<2x8x32xbf16> to vector<2x8x8xbf16>
    %48 = vector.extract_strided_slice %45 {offsets = [0, 0, 16], sizes = [2, 8, 8], strides = [1, 1, 1]} : vector<2x8x32xbf16> to vector<2x8x8xbf16>
    %49 = vector.extract_strided_slice %45 {offsets = [0, 0, 24], sizes = [2, 8, 8], strides = [1, 1, 1]} : vector<2x8x32xbf16> to vector<2x8x8xbf16>
    %50 = tpu.concatenate %46, %47, %48, %49 in 0 : vector<2x8x8xbf16>, vector<2x8x8xbf16>, vector<2x8x8xbf16>, vector<2x8x8xbf16> -> vector<8x8x8xbf16>
    %51 = arith.truncf %36 : vector<16x32xf32> to vector<16x32xbf16>
    %52 = vector.shape_cast %51 : vector<16x32xbf16> to vector<2x8x32xbf16>
    %53 = vector.extract_strided_slice %52 {offsets = [0, 0, 0], sizes = [2, 8, 8], strides = [1, 1, 1]} : vector<2x8x32xbf16> to vector<2x8x8xbf16>
    %54 = vector.extract_strided_slice %52 {offsets = [0, 0, 8], sizes = [2, 8, 8], strides = [1, 1, 1]} : vector<2x8x32xbf16> to vector<2x8x8xbf16>
    %55 = vector.extract_strided_slice %52 {offsets = [0, 0, 16], sizes = [2, 8, 8], strides = [1, 1, 1]} : vector<2x8x32xbf16> to vector<2x8x8xbf16>
    %56 = vector.extract_strided_slice %52 {offsets = [0, 0, 24], sizes = [2, 8, 8], strides = [1, 1, 1]} : vector<2x8x32xbf16> to vector<2x8x8xbf16>
    %57 = tpu.concatenate %53, %54, %55, %56 in 0 : vector<2x8x8xbf16>, vector<2x8x8xbf16>, vector<2x8x8xbf16>, vector<2x8x8xbf16> -> vector<8x8x8xbf16>
    "tpu.trace_start"() <{level = 10 : i32, message = "bqd,bkd->bqk"}> : () -> ()
    %cst_19 = arith.constant dense<0.000000e+00> : vector<8x8x8xf32>
    %58 = tpu.matmul %43, %50, %cst_19 {dimension_numbers = #tpu.dot_dimension_numbers<[2], [2], [1], [1], [0, 0, 0, 1, 1, 1], [0], [0]>} : vector<8x8x8xbf16>, vector<8x8x8xbf16>, vector<8x8x8xf32> -> vector<8x8x8xf32>
    "tpu.trace_stop"() : () -> ()
    %cst_20 = arith.constant 0.353553385 : f32
    %59 = vector.broadcast %cst_20 : f32 to vector<8x8x8xf32>
    %60 = arith.mulf %58, %59 : vector<8x8x8xf32>
    %61 = vector.broadcast %2 : vector<1x8x8xf32> to vector<8x8x8xf32>
    %62 = arith.addf %60, %61 : vector<8x8x8xf32>
    %cst_21 = arith.constant dense<0xFF800000> : vector<8x8xf32>
    %63 = vector.multi_reduction <maximumf>, %62, %cst_21 [2] : vector<8x8x8xf32> to vector<8x8xf32>
    %64 = vector.shape_cast %63 : vector<8x8xf32> to vector<8x8x1xf32>
    %65 = vector.broadcast %64 : vector<8x8x1xf32> to vector<8x8x8xf32>
    %66 = arith.subf %62, %65 : vector<8x8x8xf32>
    %67 = math.exp %66 : vector<8x8x8xf32>
    %cst_22 = arith.constant dense<0.000000e+00> : vector<8x8xf32>
    %68 = vector.multi_reduction <add>, %67, %cst_22 [2] : vector<8x8x8xf32> to vector<8x8xf32>
    %69 = vector.shape_cast %68 : vector<8x8xf32> to vector<8x8x1xf32>
    %70 = tpu.reciprocal %69 {approx = true} : vector<8x8x1xf32> -> vector<8x8x1xf32>
    %71 = vector.broadcast %70 : vector<8x8x1xf32> to vector<8x8x8xf32>
    %72 = arith.mulf %67, %71 : vector<8x8x8xf32>
    %73 = arith.truncf %72 : vector<8x8x8xf32> to vector<8x8x8xbf16>
    "tpu.trace_start"() <{level = 10 : i32, message = "bqk,bkd->bqd"}> : () -> ()
    %cst_23 = arith.constant dense<0.000000e+00> : vector<8x8x8xf32>
    %74 = tpu.matmul %73, %57, %cst_23 {dimension_numbers = #tpu.dot_dimension_numbers<[2], [1], [1], [2], [0, 0, 0, 1, 1, 2], [0], [0]>} : vector<8x8x8xbf16>, vector<8x8x8xbf16>, vector<8x8x8xf32> -> vector<8x8x8xf32>
    "tpu.trace_stop"() : () -> ()
    %75 = vector.extract_strided_slice %74 {offsets = [0, 0, 0], sizes = [2, 8, 8], strides = [1, 1, 1]} : vector<8x8x8xf32> to vector<2x8x8xf32>
    %76 = vector.extract_strided_slice %74 {offsets = [2, 0, 0], sizes = [2, 8, 8], strides = [1, 1, 1]} : vector<8x8x8xf32> to vector<2x8x8xf32>
    %77 = vector.extract_strided_slice %74 {offsets = [4, 0, 0], sizes = [2, 8, 8], strides = [1, 1, 1]} : vector<8x8x8xf32> to vector<2x8x8xf32>
    %78 = vector.extract_strided_slice %74 {offsets = [6, 0, 0], sizes = [2, 8, 8], strides = [1, 1, 1]} : vector<8x8x8xf32> to vector<2x8x8xf32>
    %79 = tpu.concatenate %75, %76, %77, %78 in 2 : vector<2x8x8xf32>, vector<2x8x8xf32>, vector<2x8x8xf32>, vector<2x8x8xf32> -> vector<2x8x32xf32>
    %80 = vector.shape_cast %79 : vector<2x8x32xf32> to vector<16x32xf32>
    %c0_24 = arith.constant 0 : index
    %c128_25 = arith.constant 128 : index
    %81 = vector.load %arg4[%c0_24, %c128_25] : memref<32x768xbf16, #tpu.memory_space<vmem>>, vector<32x32xbf16>
    %c0_26 = arith.constant 0 : index
    %c384 = arith.constant 384 : index
    %82 = vector.load %arg6[%c0_26, %c384] : memref<1x1664xf32, #tpu.memory_space<vmem>>, vector<1x32xf32>
    %83 = arith.truncf %80 : vector<16x32xf32> to vector<16x32xbf16>
    %cst_27 = arith.constant dense<0.000000e+00> : vector<16x32xf32>
    %84 = tpu.matmul %83, %81, %cst_27 {dimension_numbers = #tpu.dot_dimension_numbers<[1], [0], [0], [1], [0, 0, 1, 1], [], []>} : vector<16x32xbf16>, vector<32x32xbf16>, vector<16x32xf32> -> vector<16x32xf32>
    %85 = vector.broadcast %82 : vector<1x32xf32> to vector<16x32xf32>
    %86 = arith.addf %84, %85 : vector<16x32xf32>
    %87 = arith.addf %0, %86 : vector<16x32xf32>
    %c0_28 = arith.constant 0 : index
    %c512 = arith.constant 512 : index
    %88 = vector.load %arg6[%c0_28, %c512] : memref<1x1664xf32, #tpu.memory_space<vmem>>, vector<1x32xf32>
    %c0_29 = arith.constant 0 : index
    %c640 = arith.constant 640 : index
    %89 = vector.load %arg6[%c0_29, %c640] : memref<1x1664xf32, #tpu.memory_space<vmem>>, vector<1x32xf32>
    %cst_30 = arith.constant dense<0.000000e+00> : vector<16xf32>
    %90 = vector.multi_reduction <add>, %87, %cst_30 [1] : vector<16x32xf32> to vector<16xf32>
    %91 = vector.shape_cast %90 : vector<16xf32> to vector<16x1xf32>
    %cst_31 = arith.constant 3.200000e+01 : f32
    %92 = vector.broadcast %cst_31 : f32 to vector<16x1xf32>
    %93 = arith.divf %91, %92 : vector<16x1xf32>
    %94 = vector.broadcast %93 : vector<16x1xf32> to vector<16x32xf32>
    %95 = arith.subf %87, %94 : vector<16x32xf32>
    %96 = arith.mulf %95, %95 : vector<16x32xf32>
    %cst_32 = arith.constant dense<0.000000e+00> : vector<16xf32>
    %97 = vector.multi_reduction <add>, %96, %cst_32 [1] : vector<16x32xf32> to vector<16xf32>
    %98 = vector.shape_cast %97 : vector<16xf32> to vector<16x1xf32>
    %cst_33 = arith.constant 3.100000e+01 : f32
    %99 = vector.broadcast %cst_33 : f32 to vector<16x1xf32>
    %100 = arith.divf %98, %99 : vector<16x1xf32>
    %101 = vector.broadcast %93 : vector<16x1xf32> to vector<16x32xf32>
    %102 = arith.subf %87, %101 : vector<16x32xf32>
    %103 = vector.broadcast %88 : vector<1x32xf32> to vector<16x32xf32>
    %104 = arith.mulf %103, %102 : vector<16x32xf32>
    %105 = math.sqrt %100 : vector<16x1xf32>
    %cst_34 = arith.constant 9.99999997E-7 : f32
    %106 = vector.broadcast %cst_34 : f32 to vector<16x1xf32>
    %107 = arith.addf %105, %106 : vector<16x1xf32>
    %108 = vector.broadcast %107 : vector<16x1xf32> to vector<16x32xf32>
    %109 = arith.divf %104, %108 : vector<16x32xf32>
    %110 = vector.broadcast %89 : vector<1x32xf32> to vector<16x32xf32>
    %111 = arith.addf %109, %110 : vector<16x32xf32>
    %c0_35 = arith.constant 0 : index
    %c256_36 = arith.constant 256 : index
    %112 = vector.load %arg4[%c0_35, %c256_36] : memref<32x768xbf16, #tpu.memory_space<vmem>>, vector<32x32xbf16>
    %c0_37 = arith.constant 0 : index
    %c768 = arith.constant 768 : index
    %113 = vector.load %arg6[%c0_37, %c768] : memref<1x1664xf32, #tpu.memory_space<vmem>>, vector<1x32xf32>
    %114 = arith.truncf %111 : vector<16x32xf32> to vector<16x32xbf16>
    %cst_38 = arith.constant dense<0.000000e+00> : vector<16x32xf32>
    %115 = tpu.matmul %114, %112, %cst_38 {dimension_numbers = #tpu.dot_dimension_numbers<[1], [0], [0], [1], [0, 0, 1, 1], [], []>} : vector<16x32xbf16>, vector<32x32xbf16>, vector<16x32xf32> -> vector<16x32xf32>
    %116 = vector.broadcast %113 : vector<1x32xf32> to vector<16x32xf32>
    %117 = arith.addf %115, %116 : vector<16x32xf32>
    %c0_39 = arith.constant 0 : index
    %c384_40 = arith.constant 384 : index
    %118 = vector.load %arg4[%c0_39, %c384_40] : memref<32x768xbf16, #tpu.memory_space<vmem>>, vector<32x64xbf16>
    %c0_41 = arith.constant 0 : index
    %c896 = arith.constant 896 : index
    %119 = vector.load %arg6[%c0_41, %c896] : memref<1x1664xf32, #tpu.memory_space<vmem>>, vector<1x64xf32>
    %120 = arith.truncf %1 : vector<32x32xf32> to vector<32x32xbf16>
    %cst_42 = arith.constant dense<0.000000e+00> : vector<32x64xf32>
    %121 = tpu.matmul %120, %118, %cst_42 {dimension_numbers = #tpu.dot_dimension_numbers<[1], [0], [0], [1], [0, 0, 1, 1], [], []>} : vector<32x32xbf16>, vector<32x64xbf16>, vector<32x64xf32> -> vector<32x64xf32>
    %122 = vector.broadcast %119 : vector<1x64xf32> to vector<32x64xf32>
    %123 = arith.addf %121, %122 : vector<32x64xf32>
    %124 = vector.extract_strided_slice %123 {offsets = [0, 0], sizes = [32, 32], strides = [1, 1]} : vector<32x64xf32> to vector<32x32xf32>
    %125 = vector.extract_strided_slice %123 {offsets = [0, 32], sizes = [32, 32], strides = [1, 1]} : vector<32x64xf32> to vector<32x32xf32>
    %126 = arith.truncf %117 : vector<16x32xf32> to vector<16x32xbf16>
    %127 = vector.shape_cast %126 : vector<16x32xbf16> to vector<2x8x32xbf16>
    %128 = vector.extract_strided_slice %127 {offsets = [0, 0, 0], sizes = [2, 8, 8], strides = [1, 1, 1]} : vector<2x8x32xbf16> to vector<2x8x8xbf16>
    %129 = vector.extract_strided_slice %127 {offsets = [0, 0, 8], sizes = [2, 8, 8], strides = [1, 1, 1]} : vector<2x8x32xbf16> to vector<2x8x8xbf16>
    %130 = vector.extract_strided_slice %127 {offsets = [0, 0, 16], sizes = [2, 8, 8], strides = [1, 1, 1]} : vector<2x8x32xbf16> to vector<2x8x8xbf16>
    %131 = vector.extract_strided_slice %127 {offsets = [0, 0, 24], sizes = [2, 8, 8], strides = [1, 1, 1]} : vector<2x8x32xbf16> to vector<2x8x8xbf16>
    %132 = tpu.concatenate %128, %129, %130, %131 in 0 : vector<2x8x8xbf16>, vector<2x8x8xbf16>, vector<2x8x8xbf16>, vector<2x8x8xbf16> -> vector<8x8x8xbf16>
    %133 = arith.truncf %124 : vector<32x32xf32> to vector<32x32xbf16>
    %134 = vector.shape_cast %133 : vector<32x32xbf16> to vector<2x16x32xbf16>
    %135 = vector.extract_strided_slice %134 {offsets = [0, 0, 0], sizes = [2, 16, 8], strides = [1, 1, 1]} : vector<2x16x32xbf16> to vector<2x16x8xbf16>
    %136 = vector.extract_strided_slice %134 {offsets = [0, 0, 8], sizes = [2, 16, 8], strides = [1, 1, 1]} : vector<2x16x32xbf16> to vector<2x16x8xbf16>
    %137 = vector.extract_strided_slice %134 {offsets = [0, 0, 16], sizes = [2, 16, 8], strides = [1, 1, 1]} : vector<2x16x32xbf16> to vector<2x16x8xbf16>
    %138 = vector.extract_strided_slice %134 {offsets = [0, 0, 24], sizes = [2, 16, 8], strides = [1, 1, 1]} : vector<2x16x32xbf16> to vector<2x16x8xbf16>
    %139 = tpu.concatenate %135, %136, %137, %138 in 0 : vector<2x16x8xbf16>, vector<2x16x8xbf16>, vector<2x16x8xbf16>, vector<2x16x8xbf16> -> vector<8x16x8xbf16>
    %140 = arith.truncf %125 : vector<32x32xf32> to vector<32x32xbf16>
    %141 = vector.shape_cast %140 : vector<32x32xbf16> to vector<2x16x32xbf16>
    %142 = vector.extract_strided_slice %141 {offsets = [0, 0, 0], sizes = [2, 16, 8], strides = [1, 1, 1]} : vector<2x16x32xbf16> to vector<2x16x8xbf16>
    %143 = vector.extract_strided_slice %141 {offsets = [0, 0, 8], sizes = [2, 16, 8], strides = [1, 1, 1]} : vector<2x16x32xbf16> to vector<2x16x8xbf16>
    %144 = vector.extract_strided_slice %141 {offsets = [0, 0, 16], sizes = [2, 16, 8], strides = [1, 1, 1]} : vector<2x16x32xbf16> to vector<2x16x8xbf16>
    %145 = vector.extract_strided_slice %141 {offsets = [0, 0, 24], sizes = [2, 16, 8], strides = [1, 1, 1]} : vector<2x16x32xbf16> to vector<2x16x8xbf16>
    %146 = tpu.concatenate %142, %143, %144, %145 in 0 : vector<2x16x8xbf16>, vector<2x16x8xbf16>, vector<2x16x8xbf16>, vector<2x16x8xbf16> -> vector<8x16x8xbf16>
    "tpu.trace_start"() <{level = 10 : i32, message = "bqd,bkd->bqk"}> : () -> ()
    %cst_43 = arith.constant dense<0.000000e+00> : vector<8x8x16xf32>
    %147 = tpu.matmul %132, %139, %cst_43 {dimension_numbers = #tpu.dot_dimension_numbers<[2], [2], [1], [1], [0, 0, 0, 1, 1, 1], [0], [0]>} : vector<8x8x8xbf16>, vector<8x16x8xbf16>, vector<8x8x16xf32> -> vector<8x8x16xf32>
    "tpu.trace_stop"() : () -> ()
    %cst_44 = arith.constant 0.353553385 : f32
    %148 = vector.broadcast %cst_44 : f32 to vector<8x8x16xf32>
    %149 = arith.mulf %147, %148 : vector<8x8x16xf32>
    %150 = vector.broadcast %3 : vector<8x1x16xf32> to vector<8x8x16xf32>
    %151 = arith.addf %149, %150 : vector<8x8x16xf32>
    %cst_45 = arith.constant dense<0xFF800000> : vector<8x8xf32>
    %152 = vector.multi_reduction <maximumf>, %151, %cst_45 [2] : vector<8x8x16xf32> to vector<8x8xf32>
    %153 = vector.shape_cast %152 : vector<8x8xf32> to vector<8x8x1xf32>
    %154 = vector.broadcast %153 : vector<8x8x1xf32> to vector<8x8x16xf32>
    %155 = arith.subf %151, %154 : vector<8x8x16xf32>
    %156 = math.exp %155 : vector<8x8x16xf32>
    %cst_46 = arith.constant dense<0.000000e+00> : vector<8x8xf32>
    %157 = vector.multi_reduction <add>, %156, %cst_46 [2] : vector<8x8x16xf32> to vector<8x8xf32>
    %158 = vector.shape_cast %157 : vector<8x8xf32> to vector<8x8x1xf32>
    %159 = tpu.reciprocal %158 {approx = true} : vector<8x8x1xf32> -> vector<8x8x1xf32>
    %160 = vector.broadcast %159 : vector<8x8x1xf32> to vector<8x8x16xf32>
    %161 = arith.mulf %156, %160 : vector<8x8x16xf32>
    %162 = arith.truncf %161 : vector<8x8x16xf32> to vector<8x8x16xbf16>
    "tpu.trace_start"() <{level = 10 : i32, message = "bqk,bkd->bqd"}> : () -> ()
    %cst_47 = arith.constant dense<0.000000e+00> : vector<8x8x8xf32>
    %163 = tpu.matmul %162, %146, %cst_47 {dimension_numbers = #tpu.dot_dimension_numbers<[2], [1], [1], [2], [0, 0, 0, 1, 1, 2], [0], [0]>} : vector<8x8x16xbf16>, vector<8x16x8xbf16>, vector<8x8x8xf32> -> vector<8x8x8xf32>
    "tpu.trace_stop"() : () -> ()
    %164 = vector.extract_strided_slice %163 {offsets = [0, 0, 0], sizes = [2, 8, 8], strides = [1, 1, 1]} : vector<8x8x8xf32> to vector<2x8x8xf32>
    %165 = vector.extract_strided_slice %163 {offsets = [2, 0, 0], sizes = [2, 8, 8], strides = [1, 1, 1]} : vector<8x8x8xf32> to vector<2x8x8xf32>
    %166 = vector.extract_strided_slice %163 {offsets = [4, 0, 0], sizes = [2, 8, 8], strides = [1, 1, 1]} : vector<8x8x8xf32> to vector<2x8x8xf32>
    %167 = vector.extract_strided_slice %163 {offsets = [6, 0, 0], sizes = [2, 8, 8], strides = [1, 1, 1]} : vector<8x8x8xf32> to vector<2x8x8xf32>
    %168 = tpu.concatenate %164, %165, %166, %167 in 2 : vector<2x8x8xf32>, vector<2x8x8xf32>, vector<2x8x8xf32>, vector<2x8x8xf32> -> vector<2x8x32xf32>
    %169 = vector.shape_cast %168 : vector<2x8x32xf32> to vector<16x32xf32>
    %c0_48 = arith.constant 0 : index
    %c512_49 = arith.constant 512 : index
    %170 = vector.load %arg4[%c0_48, %c512_49] : memref<32x768xbf16, #tpu.memory_space<vmem>>, vector<32x32xbf16>
    %c0_50 = arith.constant 0 : index
    %c1024 = arith.constant 1024 : index
    %171 = vector.load %arg6[%c0_50, %c1024] : memref<1x1664xf32, #tpu.memory_space<vmem>>, vector<1x32xf32>
    %172 = arith.truncf %169 : vector<16x32xf32> to vector<16x32xbf16>
    %cst_51 = arith.constant dense<0.000000e+00> : vector<16x32xf32>
    %173 = tpu.matmul %172, %170, %cst_51 {dimension_numbers = #tpu.dot_dimension_numbers<[1], [0], [0], [1], [0, 0, 1, 1], [], []>} : vector<16x32xbf16>, vector<32x32xbf16>, vector<16x32xf32> -> vector<16x32xf32>
    %174 = vector.broadcast %171 : vector<1x32xf32> to vector<16x32xf32>
    %175 = arith.addf %173, %174 : vector<16x32xf32>
    %176 = arith.addf %87, %175 : vector<16x32xf32>
    %c0_52 = arith.constant 0 : index
    %c1152 = arith.constant 1152 : index
    %177 = vector.load %arg6[%c0_52, %c1152] : memref<1x1664xf32, #tpu.memory_space<vmem>>, vector<1x32xf32>
    %c0_53 = arith.constant 0 : index
    %c1280 = arith.constant 1280 : index
    %178 = vector.load %arg6[%c0_53, %c1280] : memref<1x1664xf32, #tpu.memory_space<vmem>>, vector<1x32xf32>
    %cst_54 = arith.constant dense<0.000000e+00> : vector<16xf32>
    %179 = vector.multi_reduction <add>, %176, %cst_54 [1] : vector<16x32xf32> to vector<16xf32>
    %180 = vector.shape_cast %179 : vector<16xf32> to vector<16x1xf32>
    %cst_55 = arith.constant 3.200000e+01 : f32
    %181 = vector.broadcast %cst_55 : f32 to vector<16x1xf32>
    %182 = arith.divf %180, %181 : vector<16x1xf32>
    %183 = vector.broadcast %182 : vector<16x1xf32> to vector<16x32xf32>
    %184 = arith.subf %176, %183 : vector<16x32xf32>
    %185 = arith.mulf %184, %184 : vector<16x32xf32>
    %cst_56 = arith.constant dense<0.000000e+00> : vector<16xf32>
    %186 = vector.multi_reduction <add>, %185, %cst_56 [1] : vector<16x32xf32> to vector<16xf32>
    %187 = vector.shape_cast %186 : vector<16xf32> to vector<16x1xf32>
    %cst_57 = arith.constant 3.100000e+01 : f32
    %188 = vector.broadcast %cst_57 : f32 to vector<16x1xf32>
    %189 = arith.divf %187, %188 : vector<16x1xf32>
    %190 = vector.broadcast %182 : vector<16x1xf32> to vector<16x32xf32>
    %191 = arith.subf %176, %190 : vector<16x32xf32>
    %192 = vector.broadcast %177 : vector<1x32xf32> to vector<16x32xf32>
    %193 = arith.mulf %192, %191 : vector<16x32xf32>
    %194 = math.sqrt %189 : vector<16x1xf32>
    %cst_58 = arith.constant 9.99999997E-7 : f32
    %195 = vector.broadcast %cst_58 : f32 to vector<16x1xf32>
    %196 = arith.addf %194, %195 : vector<16x1xf32>
    %197 = vector.broadcast %196 : vector<16x1xf32> to vector<16x32xf32>
    %198 = arith.divf %193, %197 : vector<16x32xf32>
    %199 = vector.broadcast %178 : vector<1x32xf32> to vector<16x32xf32>
    %200 = arith.addf %198, %199 : vector<16x32xf32>
    %c0_59 = arith.constant 0 : index
    %c640_60 = arith.constant 640 : index
    %201 = vector.load %arg4[%c0_59, %c640_60] : memref<32x768xbf16, #tpu.memory_space<vmem>>, vector<32x64xbf16>
    %c0_61 = arith.constant 0 : index
    %c1408 = arith.constant 1408 : index
    %202 = vector.load %arg6[%c0_61, %c1408] : memref<1x1664xf32, #tpu.memory_space<vmem>>, vector<1x64xf32>
    %203 = arith.truncf %200 : vector<16x32xf32> to vector<16x32xbf16>
    %cst_62 = arith.constant dense<0.000000e+00> : vector<16x64xf32>
    %204 = tpu.matmul %203, %201, %cst_62 {dimension_numbers = #tpu.dot_dimension_numbers<[1], [0], [0], [1], [0, 0, 1, 1], [], []>} : vector<16x32xbf16>, vector<32x64xbf16>, vector<16x64xf32> -> vector<16x64xf32>
    %205 = vector.broadcast %202 : vector<1x64xf32> to vector<16x64xf32>
    %206 = arith.addf %204, %205 : vector<16x64xf32>
    %cst_63 = arith.constant 0.000000e+00 : f32
    %207 = vector.broadcast %cst_63 : f32 to vector<16x64xf32>
    %208 = arith.maximumf %206, %207 : vector<16x64xf32>
    %c0_64 = arith.constant 0 : index
    %c0_65 = arith.constant 0 : index
    %209 = vector.load %arg5[%c0_64, %c0_65] : memref<64x32xbf16, #tpu.memory_space<vmem>>, vector<64x32xbf16>
    %c0_66 = arith.constant 0 : index
    %c1536 = arith.constant 1536 : index
    %210 = vector.load %arg6[%c0_66, %c1536] : memref<1x1664xf32, #tpu.memory_space<vmem>>, vector<1x32xf32>
    %211 = arith.truncf %208 : vector<16x64xf32> to vector<16x64xbf16>
    %cst_67 = arith.constant dense<0.000000e+00> : vector<16x32xf32>
    %212 = tpu.matmul %211, %209, %cst_67 {dimension_numbers = #tpu.dot_dimension_numbers<[1], [0], [0], [1], [0, 0, 1, 1], [], []>} : vector<16x64xbf16>, vector<64x32xbf16>, vector<16x32xf32> -> vector<16x32xf32>
    %213 = vector.broadcast %210 : vector<1x32xf32> to vector<16x32xf32>
    %214 = arith.addf %212, %213 : vector<16x32xf32>
    %215 = arith.addf %176, %214 : vector<16x32xf32>
    %216 = vector.shape_cast %215 : vector<16x32xf32> to vector<2x8x32xf32>
    %217 = vector.extract_strided_slice %216 {offsets = [0, 0, 0], sizes = [2, 1, 32], strides = [1, 1, 1]} : vector<2x8x32xf32> to vector<2x1x32xf32>
    %218 = vector.extract_strided_slice %216 {offsets = [0, 1, 0], sizes = [2, 1, 32], strides = [1, 1, 1]} : vector<2x8x32xf32> to vector<2x1x32xf32>
    %219 = vector.extract_strided_slice %216 {offsets = [0, 2, 0], sizes = [2, 1, 32], strides = [1, 1, 1]} : vector<2x8x32xf32> to vector<2x1x32xf32>
    %220 = vector.extract_strided_slice %216 {offsets = [0, 3, 0], sizes = [2, 1, 32], strides = [1, 1, 1]} : vector<2x8x32xf32> to vector<2x1x32xf32>
    %221 = vector.extract_strided_slice %216 {offsets = [0, 4, 0], sizes = [2, 1, 32], strides = [1, 1, 1]} : vector<2x8x32xf32> to vector<2x1x32xf32>
    %222 = vector.extract_strided_slice %216 {offsets = [0, 5, 0], sizes = [2, 1, 32], strides = [1, 1, 1]} : vector<2x8x32xf32> to vector<2x1x32xf32>
    %223 = vector.extract_strided_slice %216 {offsets = [0, 6, 0], sizes = [2, 1, 32], strides = [1, 1, 1]} : vector<2x8x32xf32> to vector<2x1x32xf32>
    %224 = vector.extract_strided_slice %216 {offsets = [0, 7, 0], sizes = [2, 1, 32], strides = [1, 1, 1]} : vector<2x8x32xf32> to vector<2x1x32xf32>
    %225 = tpu.concatenate %217, %218, %219, %220, %221, %222, %223, %224 in 2 : vector<2x1x32xf32>, vector<2x1x32xf32>, vector<2x1x32xf32>, vector<2x1x32xf32>, vector<2x1x32xf32>, vector<2x1x32xf32>, vector<2x1x32xf32>, vector<2x1x32xf32> -> vector<2x1x256xf32>
    %226 = vector.shape_cast %225 : vector<2x1x256xf32> to vector<2x256xf32>
    %c0_68 = arith.constant 0 : index
    %c0_69 = arith.constant 0 : index
    %227 = vector.load %arg7[%c0_68, %c0_69] : memref<2x256xf32, #tpu.memory_space<vmem>>, vector<2x256xf32>
    tpu.vector_store %arg7[%c0_68, %c0_69], %226 {strides = array<i32>} : memref<2x256xf32, #tpu.memory_space<vmem>>, vector<2x256xf32>,
    return
  }
  func.func @transform_0(%arg0: i32) -> (i32, i32) {
    %c0_i32 = arith.constant 0 : i32
    %c0_i32_0 = arith.constant 0 : i32
    %c0_i32_1 = arith.constant 0 : i32
    return %c0_i32, %c0_i32_0 : i32, i32
  }
  func.func @transform_1(%arg0: i32) -> (i32, i32, i32) {
    %c0_i32 = arith.constant 0 : i32
    %c0_i32_0 = arith.constant 0 : i32
    %c0_i32_1 = arith.constant 0 : i32
    %c0_i32_2 = arith.constant 0 : i32
    return %c0_i32, %c0_i32_0, %c0_i32_1 : i32, i32, i32
  }
  func.func @transform_2(%arg0: i32) -> (i32, i32, i32) {
    %c0_i32 = arith.constant 0 : i32
    %c0_i32_0 = arith.constant 0 : i32
    %c0_i32_1 = arith.constant 0 : i32
    %c0_i32_2 = arith.constant 0 : i32
    return %c0_i32, %c0_i32_0, %c0_i32_1 : i32, i32, i32
  }
  func.func @transform_3(%arg0: i32) -> (i32, i32) {
    %c0_i32 = arith.constant 0 : i32
    %c0_i32_0 = arith.constant 0 : i32
    %c0_i32_1 = arith.constant 0 : i32
    return %c0_i32, %c0_i32_0 : i32, i32
  }
  func.func @transform_4(%arg0: i32) -> (i32, i32) {
    %c0_i32 = arith.constant 0 : i32
    %c0_i32_0 = arith.constant 0 : i32
    %c0_i32_1 = arith.constant 0 : i32
    return %c0_i32, %c0_i32_0 : i32, i32
  }
  func.func @transform_5(%arg0: i32) -> (i32, i32) {
    %c0_i32 = arith.constant 0 : i32
    %c0_i32_0 = arith.constant 0 : i32
    %c0_i32_1 = arith.constant 0 : i32
    return %c0_i32, %c0_i32_0 : i32, i32
  }
  func.func @transform_6(%arg0: i32) -> (i32, i32) {
    %c0_i32 = arith.constant 0 : i32
    %c0_i32_0 = arith.constant 0 : i32
    %c0_i32_1 = arith.constant 0 : i32
    return %c0_i32, %c0_i32_0 : i32, i32
  }
}

</mosaic_0001>

<bundles_post_ra>
// kernel: tpu_custom_call.1
= control target key start
LH: loop header
LB: loop body
LE: loop exit
PB: predicated region body
PF: predicated region fallthrough
CT: control target
= control target key end

     0   :  { %vm42_vm0 = vcmask 261120   ;;  %s4061_s0 = inlined_call_operand.vmem [shape: f32[48,32], index: 0, kind: input, shape index: {}]   ;;  %s4062_s1 = inlined_call_operand.vmem [shape: f32[1,8,8], index: 1, kind: input, shape index: {}]   ;;  %s4063_s2 = inlined_call_operand.vmem [shape: f32[8,1,16], index: 2, kind: input, shape index: {}]   ;;  %s4064_s3 = inlined_call_operand.vmem [shape: bf16[32,768], index: 3, kind: input, shape index: {}]   ;;  %s4065_s4 = inlined_call_operand.vmem [shape: bf16[64,32], index: 4, kind: input, shape index: {}]   ;;  %s4066_s5 = inlined_call_operand.vmem [shape: f32[1,1664], index: 5, kind: input, shape index: {}]   ;;  %s4067_s6 = inlined_call_operand.hbm [shape: f32[2,256], index: 6, kind: output, shape index: {}]  }
   0x1   :  { %v3403_v0 = vld [vmem:[%s4061_s0] sm:$0xff]  ;;  %v3408_v1 = vld [vmem:[%s4061_s0 + $0x8] sm:$0xff] }
   0x2   :  { %v43_v2 = vsel %vm42_vm0, %v3403_v0, 0.0  ;;  %v46_v3 = vsel %vm42_vm0, %v3408_v1, 0.0 }
   0x3   :  { %44 = vadd.xlane.f32.xlu0 %v43_v2 }
   0x7   :  { %47 = vadd.xlane.f32.xlu0 %v46_v3 }
   0x8   :  { %11 = vsyncpa [#allocation3], 0  ;;  %v3224_v14 = vld [vmem:[%s4064_s3] ss:$24 sps:$4 sm:$0xff]   ;;  %v3352_v15 = vmov 0.0   ;;  %vm3353_vm1 = vmmov 0  }
   0x9   :  { %2929 = vmatprep.subr.bf16.mxu1 %v3352_v15  ;;  %2933 = vmatprep.mubr.msk.bf16.mxu1 %vm3353_vm1, %v3352_v15  ;;  %v3225_v16 = vld [vmem:[%s4064_s3 + $0x30] ss:$24 sps:$4 sm:$0xff]   ;;  %v2750_v33 = vld [vmem:[%s4066_s5] ss:$0 sm:$0xff]  ;;  %v2751_v39 = vld [vmem:[%s4066_s5 + $0x1] ss:$0 sm:$0xff] }
   0xa   :  { %2930 = vmatpush3.bf16.msra.mxu1 %v3224_v14  ;;  %2943 = vmatprep.subr.bf16.mxu0 %v3352_v15  ;;  %v2752_v44 = vld [vmem:[%s4066_s5 + $0x2] ss:$0 sm:$0xff]  ;;  %s3354_s11 = smov 120   ;;  %s3355_s12 = smov 104   ;;  %vm189_vm6 = vcmask 64512   ;;  %vm701_vm7 = vcmask 1043456  }
   0xb   :  { %2931 = vmatprep.subr.bf16.mxu1 %v3352_v15  ;;  %2945 = vmatprep.mubr.msk.bf16.mxu0 %vm3353_vm1, %v3352_v15  ;;  %s3356_s13 = smov 112   ;;  %s3357_s14 = smov 96   ;;  %vm1107_vm8 = vcmask 130048   ;;  %vm1110_vm9 = vcmask 195584  }
   0xc   :  { %s3359_s17 = smov 8   ;;  %s3360_s20 = smov 16  }
   0xd   :  { %s3361_s23 = smov 24  }
   0xe   :  { %2932 = vmatpush3.bf16.msra.mxu1 %v3225_v16 }
   0xf   :  { %2937 = vmatprep.subr.bf16.mxu1 %v3352_v15 }
  0x90   :  { %v45_v4 = vpop.xlane.xlu0 %44 }
  0x91   :  { %v50_v5 = vmul.f32 0.03125, %v45_v4 }
  0x93   :  { %v52_v6 = vsub.f32 %v3403_v0, %v50_v5 }
  0x94   :  { %v48_v7 = vpop.xlane.xlu0 %47 }
  0x95   :  { %v51_v8 = vmul.f32 0.03125, %v48_v7  ;;  %v54_v9 = vmul.f32 %v52_v6, %v52_v6  ;;  %v71_v35 = vmul.f32 %v2750_v33, %v52_v6 }
  0x97   :  { %v53_v10 = vsub.f32 %v3408_v1, %v51_v8  ;;  %v56_v11 = vsel %vm42_vm0, %v54_v9, 0.0 }
  0x98   :  { %57 = vadd.xlane.f32.xlu1 %v56_v11 }
  0x99   :  { %v55_v12 = vmul.f32 %v53_v10, %v53_v10  ;;  %v72_v36 = vmul.f32 %v2750_v33, %v53_v10 }
  0x9b   :  { %v59_v13 = vsel %vm42_vm0, %v55_v12, 0.0 }
  0x9c   :  { %60 = vadd.xlane.f32.xlu1 %v59_v13 }
 0x125   :  { %v58_v17 = vpop.xlane.xlu1 %57 }
 0x126   :  { %v63_v18 = vmul.f32 0.032258064, %v58_v17 }
 0x128   :  { %3240 = vrsqrt.f32 %v63_v18  ;;  %vm75_vm2 = vcmp.eq.f32.partialorder %v63_v18, inf  ;;  %v78_v23 = vand.u32 2147483648, %v63_v18  ;;  %vm77_vm3 = vcmp.eq.f32.partialorder %v63_v18, 0.0 }
 0x129   :  { %v61_v19 = vpop.xlane.xlu1 %60 }
 0x12a   :  { %v64_v20 = vmul.f32 0.032258064, %v61_v19 }
 0x12c   :  { %3242 = vrsqrt.f32 %v64_v20  ;;  %vm82_vm4 = vcmp.eq.f32.partialorder %v64_v20, inf  ;;  %v85_v29 = vand.u32 2147483648, %v64_v20  ;;  %vm84_vm5 = vcmp.eq.f32.partialorder %v64_v20, 0.0 }
 0x132   :  { %v3241_v21 = vpop.eup %3240 }
 0x133   :  { %v74_v22 = vmul.f32 %v3241_v21, %v63_v18  ;;  %v3533_v21 = vld [vmem:[%s4062_s1] sm:$0xff]  ;;  %s3358_s1 = smov 64  }
 0x135   :  { %v76_v24 = vsel %vm75_vm2, %v63_v18, %v74_v22 }
 0x136   :  { %v3243_v25 = vpop.eup %3242  ;;  %v79_v26 = vsel %vm77_vm3, %v78_v23, %v76_v24  ;;  %vm2587_vm3 = vcmask 523264  }
 0x137   :  { %v87_v27 = vadd.f32 1e-06, %v79_v26  ;;  %v81_v28 = vmul.f32 %v3243_v25, %v64_v20 }
 0x139   :  { %v83_v30 = vsel %vm82_vm4, %v64_v20, %v81_v28  ;;  %3244 = vrcp.f32 %v87_v27  ;;  %vm2692_vm4 = vcmask 785408  }
 0x13a   :  { %v86_v31 = vsel %vm84_vm5, %v85_v29, %v83_v30  ;;  %vm2726_vm5 = vcmask 1041409  }
 0x13b   :  { %v88_v32 = vadd.f32 1e-06, %v86_v31 }
 0x13d   :  { %3246 = vrcp.f32 %v88_v32 }
 0x143   :  { %v3245_v34 = vpop.eup %3244 }
 0x144   :  { %v90_v37 = vmul.f32 %v3245_v34, %v71_v35 }
 0x146   :  { %v99_v41 = vadd.f32 %v2751_v39, %v90_v37 }
 0x147   :  { %v3247_v38 = vpop.eup %3246 }
 0x148   :  { %v92_v40 = vmul.f32 %v3247_v38, %v72_v36 }
 0x14a   :  { %v100_v42 = vadd.f32 %v2751_v39, %v92_v40 }
 0x14c   :  { %v106_v43 = vpack.c.bf16 %v100_v42, %v99_v41 }
 0x14e   :  { %2934 = vmatmul.mubr.msk.bf16.vlgmr.msra.gmra.mrb[0].mxu1 %vm42_vm0, %v106_v43 }
 0x14f   :  { %2939 = vmatprep.mubr.msk.bf16.mxu1 %vm3353_vm1, %v3352_v15 }
 0x221   :  { %v162_v45 = vpop.f32.mrb[0].mxu1 }
 0x222   :  { %v163_v46 = vadd.f32 %v2752_v44, %v162_v45  ;;  %v2935_v47 = vpop.f32.mrb[1].mxu1 }
 0x223   :  { %v165_v48 = vpop.f32.mrb[2].mxu1 }
 0x224   :  { %v3444_v49 = vpack.c.bf16 %v163_v46, %v163_v46  ;;  %v166_v50 = vadd.f32 %v2752_v44, %v165_v48  ;;  %v2936_v51 = vpop.f32.mrb[3].mxu1 }
 0x226   :  { %v3446_v52 = vpack.c.bf16 %v166_v50, %v166_v50  ;;  %175 = vrot.lane.b32.xlu0 %v3444_v49, %s3354_s11 }
 0x228   :  { %177 = vrot.lane.b32.xlu1 %v3446_v52, %s3354_s11 }
 0x22a   :  { %183 = vrot.lane.b32.xlu0 %v3444_v49, %s3355_s12 }
 0x22c   :  { %179 = vrot.lane.b32.xlu1 %v3444_v49, %s3356_s13 }
 0x22e   :  { %187 = vrot.lane.b32.xlu0 %v3444_v49, %s3357_s14 }
 0x230   :  { %181 = vrot.lane.b32.xlu1 %v3446_v52, %s3356_s13 }
 0x234   :  { %185 = vrot.lane.b32.xlu1 %v3446_v52, %s3355_s12 }
 0x238   :  { %236 = vrot.lane.b32.xlu1 %v3446_v52, %s3357_s14 }
 0x298   :  { %v176_v53 = vpop.permute.xlu0 %175 }
 0x299   :  { %v3464_v54 = vcombine.low %v176_v53, %v176_v53 }
 0x29a   :  { %v178_v55 = vpop.permute.xlu1 %177 }
 0x29b   :  { %v3466_v56 = vcombine.low %v178_v55, %v178_v55  ;;  %286 = vrot.lane.b32.xlu0 %v3464_v54, %s3357_s14 }
 0x29c   :  { %v184_v57 = vpop.permute.xlu0 %183 }
 0x29d   :  { %336 = vrot.lane.b32.xlu1 %v3466_v56, %s3357_s14  ;;  %v3477_v63 = vcombine.low %v184_v57, %v184_v57 }
 0x29e   :  { %v180_v58 = vpop.permute.xlu1 %179 }
 0x29f   :  { %v3472_v59 = vcombine.low %v180_v58, %v180_v58 }
 0x2a0   :  { %v188_v60 = vpop.permute.xlu0 %187 }
 0x2a1   :  { %v194_v61 = vsel %vm189_vm6, %v188_v60, 0  ;;  %386 = vrot.lane.b32.xlu0 %v3472_v59, %s3357_s14 }
 0x2a2   :  { %2938 = vmatpush3.bf16.xpose.msra.mxu1 %v194_v61  ;;  %v182_v62 = vpop.permute.xlu1 %181 }
 0x2a3   :  { %v3479_v2 = vcombine.low %v182_v62, %v182_v62  ;;  %2949 = vmatprep.subr.bf16.mxu1 %v3352_v15 }
 0x2a5   :  { %486 = vrot.lane.b32.xlu0 %v3477_v63, %s3357_s14  ;;  %436 = vrot.lane.b32.xlu1 %v3479_v2, %s3357_s14 }
 0x2a6   :  { %v186_v3 = vpop.permute.xlu1 %185 }
 0x2a7   :  { %v3486_v4 = vcombine.low %v186_v3, %v186_v3 }
 0x2a9   :  { %2940 = vmatmul.mubr.msk.bf16.vlgmr.msra.gmra.mrb[4].mxu1 %vm189_vm6, %v3444_v49  ;;  %536 = vrot.lane.b32.xlu1 %v3486_v4, %s3357_s14 }
 0x2aa   :  { %v237_v5 = vpop.permute.xlu1 %236  ;;  %2951 = vmatprep.mubr.msk.bf16.mxu1 %vm3353_vm1, %v3352_v15 }
 0x2ab   :  { %v242_v6 = vsel %vm189_vm6, %v237_v5, 0 }
 0x2ac   :  { %2944 = vmatpush3.bf16.xpose.msra.mxu0 %v242_v6 }
 0x2ad   :  { %2955 = vmatprep.subr.bf16.mxu0 %v3352_v15 }
 0x2b3   :  { %2946 = vmatmul.mubr.msk.bf16.vlgmr.msra.gmra.mrb[0].mxu0 %vm189_vm6, %v3446_v52 }
 0x2b4   :  { %2957 = vmatprep.mubr.msk.bf16.mxu0 %vm3353_vm1, %v3352_v15 }
 0x30d   :  { %v287_v7 = vpop.permute.xlu0 %286 }
 0x30e   :  { %v292_v8 = vsel %vm189_vm6, %v287_v7, 0 }
 0x30f   :  { %2950 = vmatpush3.bf16.xpose.msra.mxu1 %v292_v8  ;;  %v337_v9 = vpop.permute.xlu1 %336 }
 0x310   :  { %v342_v10 = vsel %vm189_vm6, %v337_v9, 0  ;;  %2961 = vmatprep.subr.bf16.mxu1 %v3352_v15 }
 0x311   :  { %2956 = vmatpush3.bf16.xpose.msra.mxu0 %v342_v10 }
 0x312   :  { %2967 = vmatprep.subr.bf16.mxu0 %v3352_v15 }
 0x313   :  { %v387_v11 = vpop.permute.xlu0 %386 }
 0x314   :  { %v392_v12 = vsel %vm189_vm6, %v387_v11, 0 }
 0x316   :  { %2952 = vmatmul.mubr.msk.bf16.vlgmr.msra.gmra.mrb[8].mxu1 %vm189_vm6, %v176_v53 }
 0x317   :  { %2962 = vmatpush3.bf16.xpose.msra.mxu1 %v392_v12  ;;  %v437_v13 = vpop.permute.xlu1 %436  ;;  %2963 = vmatprep.mubr.msk.bf16.mxu1 %vm3353_vm1, %v3352_v15  ;;  %v487_v16 = vpop.permute.xlu0 %486 }
 0x318   :  { %v442_v14 = vsel %vm189_vm6, %v437_v13, 0  ;;  %2958 = vmatmul.mubr.msk.bf16.vlgmr.msra.gmra.mrb[4].mxu0 %vm189_vm6, %v178_v55  ;;  %2973 = vmatprep.subr.bf16.mxu1 %v3352_v15  ;;  %v492_v18 = vsel %vm189_vm6, %v487_v16, 0 }
 0x319   :  { %2968 = vmatpush3.bf16.xpose.msra.mxu0 %v442_v14  ;;  %2969 = vmatprep.mubr.msk.bf16.mxu0 %vm3353_vm1, %v3352_v15 }
 0x31a   :  { %2979 = vmatprep.subr.bf16.mxu0 %v3352_v15 }
 0x31b   :  { %v537_v17 = vpop.permute.xlu1 %536 }
 0x31c   :  { %v542_v19 = vsel %vm189_vm6, %v537_v17, 0 }
 0x31e   :  { %2964 = vmatmul.mubr.msk.bf16.vlgmr.msra.gmra.mrb[12].mxu1 %vm189_vm6, %v180_v58 }
 0x31f   :  { %2974 = vmatpush3.bf16.xpose.msra.mxu1 %v492_v18  ;;  %2975 = vmatprep.mubr.msk.bf16.mxu1 %vm3353_vm1, %v3352_v15 }
 0x320   :  { %2970 = vmatmul.mubr.msk.bf16.vlgmr.msra.gmra.mrb[8].mxu0 %vm189_vm6, %v182_v62  ;;  %2985 = vmatprep.subr.bf16.mxu1 %v3352_v15 }
 0x321   :  { %2980 = vmatpush3.bf16.xpose.msra.mxu0 %v542_v19  ;;  %2981 = vmatprep.mubr.msk.bf16.mxu0 %vm3353_vm1, %v3352_v15 }
 0x322   :  { %2991 = vmatprep.subr.bf16.mxu0 %v3352_v15 }
 0x326   :  { %2976 = vmatmul.mubr.msk.bf16.vlgmr.msra.gmra.mrb[16].mxu1 %vm189_vm6, %v184_v57 }
 0x327   :  { %2987 = vmatprep.mubr.msk.bf16.mxu1 %vm3353_vm1, %v3352_v15 }
 0x328   :  { %2982 = vmatmul.mubr.msk.bf16.vlgmr.msra.gmra.mrb[12].mxu0 %vm189_vm6, %v186_v3 }
 0x329   :  { %2993 = vmatprep.mubr.msk.bf16.mxu0 %vm3353_vm1, %v3352_v15 }
 0x37c   :  { %v230_v20 = vpop.f32.mrb[4].mxu1 }
 0x37d   :  { %v584_v22 = vmul.f32 0.35355338, %v230_v20  ;;  %v2941_v23 = vpop.f32.mrb[5].mxu1 }
 0x37e   :  { %v233_v24 = vpop.f32.mrb[6].mxu1 }
 0x37f   :  { %v2942_v25 = vpop.f32.mrb[7].mxu1  ;;  %v592_v26 = vadd.f32 %v584_v22, %v3533_v21 }
 0x381   :  { %v600_v27 = vsel %vm189_vm6, %v592_v26, -inf }
 0x382   :  { %601 = vmax.xlane.f32.xlu0 %v600_v27 }
 0x386   :  { %v278_v28 = vpop.f32.mrb[0].mxu0 }
 0x387   :  { %v585_v29 = vmul.f32 0.35355338, %v278_v28  ;;  %v2947_v30 = vpop.f32.mrb[1].mxu0 }
 0x388   :  { %v281_v31 = vpop.f32.mrb[2].mxu0 }
 0x389   :  { %v2948_v32 = vpop.f32.mrb[3].mxu0  ;;  %v3538_v33 = vadd.f32 %v585_v29, %v3533_v21 }
 0x38b   :  { %v603_v34 = vsel %vm189_vm6, %v3538_v33, -inf }
 0x38c   :  { %604 = vmax.xlane.f32.xlu1 %v603_v34 }
 0x3e9   :  { %v328_v35 = vpop.f32.mrb[8].mxu1 }
 0x3ea   :  { %v586_v36 = vmul.f32 0.35355338, %v328_v35  ;;  %v2953_v37 = vpop.f32.mrb[9].mxu1 }
 0x3eb   :  { %v331_v38 = vpop.f32.mrb[10].mxu1  ;;  %v378_v39 = vpop.f32.mrb[4].mxu0 }
 0x3ec   :  { %v587_v40 = vmul.f32 0.35355338, %v378_v39  ;;  %v2954_v41 = vpop.f32.mrb[11].mxu1  ;;  %v2959_v42 = vpop.f32.mrb[5].mxu0  ;;  %v594_v43 = vadd.f32 %v586_v36, %v3533_v21 }
 0x3ed   :  { %v381_v44 = vpop.f32.mrb[6].mxu0 }
 0x3ee   :  { %v2960_v45 = vpop.f32.mrb[7].mxu0  ;;  %v606_v46 = vsel %vm189_vm6, %v594_v43, -inf  ;;  %v3545_v47 = vadd.f32 %v587_v40, %v3533_v21 }
 0x3ef   :  { %607 = vmax.xlane.f32.xlu0 %v606_v46 }
 0x3f0   :  { %v609_v53 = vsel %vm189_vm6, %v3545_v47, -inf }
 0x3f1   :  { %v428_v48 = vpop.f32.mrb[12].mxu1 }
 0x3f2   :  { %v588_v50 = vmul.f32 0.35355338, %v428_v48  ;;  %v2965_v51 = vpop.f32.mrb[13].mxu1 }
 0x3f3   :  { %v478_v55 = vpop.f32.mrb[8].mxu0  ;;  %610 = vmax.xlane.f32.xlu0 %v609_v53  ;;  %v431_v57 = vpop.f32.mrb[14].mxu1 }
 0x3f4   :  { %v589_v58 = vmul.f32 0.35355338, %v478_v55  ;;  %v2966_v60 = vpop.f32.mrb[15].mxu1  ;;  %v2971_v61 = vpop.f32.mrb[9].mxu0  ;;  %v3550_v62 = vadd.f32 %v588_v50, %v3533_v21 }
 0x3f5   :  { %v481_v3 = vpop.f32.mrb[10].mxu0 }
 0x3f6   :  { %v2972_v5 = vpop.f32.mrb[11].mxu0  ;;  %v612_v6 = vsel %vm189_vm6, %v3550_v62, -inf  ;;  %v597_v7 = vadd.f32 %v589_v58, %v3533_v21 }
 0x3f7   :  { %613 = vmax.xlane.f32.xlu0 %v612_v6 }
 0x3f8   :  { %v615_v8 = vsel %vm189_vm6, %v597_v7, -inf }
 0x3f9   :  { %616 = vmax.xlane.f32.xlu1 %v615_v8  ;;  %v528_v9 = vpop.f32.mrb[16].mxu1 }
 0x3fa   :  { %v590_v10 = vmul.f32 0.35355338, %v528_v9  ;;  %v2977_v11 = vpop.f32.mrb[17].mxu1 }
 0x3fb   :  { %v531_v12 = vpop.f32.mrb[18].mxu1  ;;  %v578_v13 = vpop.f32.mrb[12].mxu0 }
 0x3fc   :  { %v2978_v14 = vpop.f32.mrb[19].mxu1  ;;  %v2983_v16 = vpop.f32.mrb[13].mxu0  ;;  %v3557_v17 = vadd.f32 %v590_v10, %v3533_v21  ;;  %v591_v25 = vmul.f32 0.35355338, %v578_v13 }
 0x3fd   :  { %v581_v18 = vpop.f32.mrb[14].mxu0 }
 0x3fe   :  { %v2984_v19 = vpop.f32.mrb[15].mxu0  ;;  %v618_v20 = vsel %vm189_vm6, %v3557_v17, -inf  ;;  %v599_v27 = vadd.f32 %v591_v25, %v3533_v21 }
 0x3ff   :  { %619 = vmax.xlane.f32.xlu0 %v618_v20 }
 0x400   :  { %v621_v29 = vsel %vm189_vm6, %v599_v27, -inf }
 0x40a   :  { %745 = vrot.lane.b32.xlu1 %v3446_v52, %s3358_s1 }
 0x40e   :  { %793 = vrot.lane.b32.xlu1 %v3464_v54, %s3358_s1 }
 0x40f   :  { %v602_v22 = vpop.xlane.xlu0 %601 }
 0x410   :  { %v624_v23 = vsub.f32 %v592_v26, %v602_v22 }
 0x412   :  { %v632_v24 = vmul.f32 1.442695, %v624_v23 }
 0x414   :  { %3248 = vpow2.f32 %v632_v24 }
 0x415   :  { %696 = vrot.lane.b32.xlu0 %v3444_v49, %s3358_s1 }
 0x419   :  { %v605_v49 = vpop.xlane.xlu1 %604 }
 0x41a   :  { %v625_v54 = vsub.f32 %v3538_v33, %v605_v49 }
 0x41c   :  { %v634_v26 = vmul.f32 1.442695, %v625_v54 }
 0x41e   :  { %v3568_v28 = vpop.eup %3248  ;;  %3250 = vpow2.f32 %v634_v26 }
 0x41f   :  { %v648_v52 = vsel %vm189_vm6, %v3568_v28, 0.0 }
 0x428   :  { %v3576_v30 = vpop.eup %3250 }
 0x429   :  { %v651_v21 = vsel %vm189_vm6, %v3576_v30, 0.0 }
 0x432   :  { %622 = vmax.xlane.f32.xlu1 %v621_v29 }
 0x434   :  { %649 = vadd.xlane.f32.xlu0 %v648_v52 }
 0x443   :  { %841 = vrot.lane.b32.xlu1 %v3466_v56, %s3358_s1 }
 0x467   :  { %652 = vadd.xlane.f32.xlu1 %v651_v21 }
 0x478   :  { %937 = vrot.lane.b32.xlu1 %v3479_v2, %s3358_s1 }
 0x47c   :  { %v608_v31 = vpop.xlane.xlu0 %607 }
 0x47d   :  { %v626_v32 = vsub.f32 %v594_v43, %v608_v31 }
 0x47f   :  { %v636_v34 = vmul.f32 1.442695, %v626_v32 }
 0x480   :  { %v611_v35 = vpop.xlane.xlu0 %610 }
 0x481   :  { %3252 = vpow2.f32 %v636_v34  ;;  %v627_v56 = vsub.f32 %v3545_v47, %v611_v35 }
 0x483   :  { %v638_v37 = vmul.f32 1.442695, %v627_v56 }
 0x484   :  { %v614_v33 = vpop.xlane.xlu0 %613 }
 0x485   :  { %3254 = vpow2.f32 %v638_v37  ;;  %v628_v51 = vsub.f32 %v3550_v62, %v614_v33 }
 0x486   :  { %v617_v36 = vpop.xlane.xlu1 %616 }
 0x487   :  { %v629_v38 = vsub.f32 %v597_v7, %v617_v36  ;;  %v640_v53 = vmul.f32 1.442695, %v628_v51 }
 0x489   :  { %v642_v43 = vmul.f32 1.442695, %v629_v38 }
 0x48a   :  { %v746_v39 = vpop.permute.xlu1 %745 }
 0x48b   :  { %v3583_v40 = vpop.eup %3252  ;;  %v751_v41 = vsel %vm701_vm7, %v746_v39, 0  ;;  %3256 = vpow2.f32 %v642_v43 }
 0x48c   :  { %2992 = vmatpush3.bf16.msra.mxu0 %v751_v41  ;;  %v620_v42 = vpop.xlane.xlu0 %619  ;;  %v654_v2 = vsel %vm189_vm6, %v3583_v40, 0.0  ;;  %3258 = vpow2.f32 %v640_v53 }
 0x48d   :  { %655 = vadd.xlane.f32.xlu0 %v654_v2  ;;  %3003 = vmatprep.subr.bf16.mxu0 %v3352_v15  ;;  %v630_v55 = vsub.f32 %v3557_v17, %v620_v42 }
 0x48e   :  { %v794_v58 = vpop.permute.xlu1 %793 }
 0x48f   :  { %v3591_v46 = vpop.eup %3254  ;;  %v644_v57 = vmul.f32 1.442695, %v630_v55  ;;  %v799_v13 = vsel %vm701_vm7, %v794_v58, 0 }
 0x490   :  { %v697_v44 = vpop.permute.xlu0 %696  ;;  %v657_v47 = vsel %vm189_vm6, %v3591_v46, 0.0 }
 0x491   :  { %v703_v45 = vsel %vm701_vm7, %v697_v44, 0  ;;  %3260 = vpow2.f32 %v644_v57 }
 0x492   :  { %2986 = vmatpush3.bf16.msra.mxu1 %v703_v45 }
 0x493   :  { %2997 = vmatprep.subr.bf16.mxu1 %v3352_v15 }
 0x495   :  { %v3595_v48 = vpop.eup %3256 }
 0x496   :  { %v663_v50 = vsel %vm189_vm6, %v3595_v48, 0.0  ;;  %v3603_v60 = vpop.eup %3258 }
 0x497   :  { %v660_v6 = vsel %vm189_vm6, %v3603_v60, 0.0 }
 0x49b   :  { %v3607_v7 = vpop.eup %3260 }
 0x49c   :  { %658 = vadd.xlane.f32.xlu1 %v657_v47  ;;  %v666_v62 = vsel %vm189_vm6, %v3607_v7, 0.0 }
 0x4a0   :  { %664 = vadd.xlane.f32.xlu1 %v663_v50 }
 0x4a3   :  { %889 = vrot.lane.b32.xlu0 %v3472_v59, %s3358_s1 }
 0x4bf   :  { %v623_v61 = vpop.xlane.xlu1 %622 }
 0x4c0   :  { %v631_v3 = vsub.f32 %v599_v27, %v623_v61 }
 0x4c1   :  { %v650_v5 = vpop.xlane.xlu0 %649 }
 0x4c2   :  { %v646_v59 = vmul.f32 1.442695, %v631_v3  ;;  %3262 = vrcp.f32 %v650_v5  ;;  %661 = vadd.xlane.f32.xlu0 %v660_v6 }
 0x4c3   :  { %v842_v14 = vpop.permute.xlu1 %841 }
 0x4c4   :  { %3264 = vpow2.f32 %v646_v59  ;;  %v847_v20 = vsel %vm701_vm7, %v842_v14, 0 }
 0x4c6   :  { %667 = vadd.xlane.f32.xlu0 %v666_v62 }
 0x4cc   :  { %v3263_v8 = vpop.eup %3262 }
 0x4cd   :  { %v680_v9 = vmul.f32 %v3263_v8, %v3568_v28 }
 0x4ce   :  { %v3612_v10 = vpop.eup %3264 }
 0x4cf   :  { %v669_v11 = vsel %vm189_vm6, %v3612_v10, 0.0  ;;  %v688_v12 = vpack.c.bf16 %v680_v9, %v680_v9 }
 0x4d0   :  { %670 = vadd.xlane.f32.xlu1 %v669_v11 }
 0x4d1   :  { %2988 = vmatmul.mubr.msk.bf16.vlgmr.msra.gmra.mrb[20].mxu1 %vm189_vm6, %v688_v12  ;;  %v3226_v12 = vld [vmem:[%s4064_s3 + $0x4] ss:$24 sps:$4 sm:$0xff]  }
 0x4d2   :  { %2998 = vmatpush3.bf16.msra.mxu1 %v799_v13  ;;  %2999 = vmatprep.mubr.msk.bf16.mxu1 %vm3353_vm1, %v3352_v15 }
 0x4d3   :  { %3009 = vmatprep.subr.bf16.mxu1 %v3352_v15 }
 0x4dc   :  { %985 = vrot.lane.b32.xlu0 %v3477_v63, %s3358_s1 }
 0x4e1   :  { %1033 = vrot.lane.b32.xlu1 %v3486_v4, %s3358_s1 }
 0x4f4   :  { %v653_v16 = vpop.xlane.xlu1 %652 }
 0x4f5   :  { %3266 = vrcp.f32 %v653_v16 }
 0x4f8   :  { %v938_v22 = vpop.permute.xlu1 %937 }
 0x4ff   :  { %v3267_v17 = vpop.eup %3266 }
 0x500   :  { %v681_v18 = vmul.f32 %v3267_v17, %v3576_v30  ;;  %v943_v30 = vsel %vm701_vm7, %v938_v22, 0 }
 0x502   :  { %v689_v19 = vpack.c.bf16 %v681_v18, %v681_v18 }
 0x504   :  { %2994 = vmatmul.mubr.msk.bf16.vlgmr.msra.gmra.mrb[16].mxu0 %vm189_vm6, %v689_v19  ;;  %v3227_v19 = vld [vmem:[%s4064_s3 + $0x34] ss:$24 sps:$4 sm:$0xff]  }
 0x505   :  { %3004 = vmatpush3.bf16.msra.mxu0 %v847_v20  ;;  %3005 = vmatprep.mubr.msk.bf16.mxu0 %vm3353_vm1, %v3352_v15 }
 0x506   :  { %3015 = vmatprep.subr.bf16.mxu0 %v3352_v15 }
 0x51a   :  { %v656_v63 = vpop.xlane.xlu0 %655 }
 0x51b   :  { %3268 = vrcp.f32 %v656_v63 }
 0x51e   :  { %v890_v24 = vpop.permute.xlu0 %889 }
 0x51f   :  { %v895_v28 = vsel %vm701_vm7, %v890_v24, 0 }
 0x525   :  { %v3269_v4 = vpop.eup %3268 }
 0x526   :  { %v682_v23 = vmul.f32 %v3269_v4, %v3583_v40 }
 0x528   :  { %v690_v25 = vpack.c.bf16 %v682_v23, %v682_v23 }
 0x529   :  { %v659_v27 = vpop.xlane.xlu1 %658 }
 0x52a   :  { %3270 = vrcp.f32 %v659_v27  ;;  %3000 = vmatmul.mubr.msk.bf16.vlgmr.msra.gmra.mrb[24].mxu1 %vm189_vm6, %v690_v25 }
 0x52b   :  { %3010 = vmatpush3.bf16.msra.mxu1 %v895_v28  ;;  %3011 = vmatprep.mubr.msk.bf16.mxu1 %vm3353_vm1, %v3352_v15 }
 0x52c   :  { %3021 = vmatprep.subr.bf16.mxu1 %v3352_v15 }
 0x52d   :  { %v665_v29 = vpop.xlane.xlu1 %664 }
 0x52e   :  { %3272 = vrcp.f32 %v665_v29 }
 0x534   :  { %v3271_v52 = vpop.eup %3270 }
 0x535   :  { %v683_v49 = vmul.f32 %v3271_v52, %v3591_v46 }
 0x537   :  { %v691_v54 = vpack.c.bf16 %v683_v49, %v683_v49 }
 0x538   :  { %v3273_v26 = vpop.eup %3272 }
 0x539   :  { %3006 = vmatmul.mubr.msk.bf16.vlgmr.msra.gmra.mrb[20].mxu0 %vm189_vm6, %v691_v54  ;;  %v685_v21 = vmul.f32 %v3273_v26, %v3595_v48 }
 0x53a   :  { %3016 = vmatpush3.bf16.msra.mxu0 %v943_v30  ;;  %3017 = vmatprep.mubr.msk.bf16.mxu0 %vm3353_vm1, %v3352_v15 }
 0x53b   :  { %3027 = vmatprep.subr.bf16.mxu0 %v3352_v15  ;;  %v693_v31 = vpack.c.bf16 %v685_v21, %v685_v21 }
 0x541   :  { %3018 = vmatmul.mubr.msk.bf16.vlgmr.msra.gmra.mrb[24].mxu0 %vm189_vm6, %v693_v31 }
 0x542   :  { %3029 = vmatprep.mubr.msk.bf16.mxu0 %vm3353_vm1, %v3352_v15 }
 0x54f   :  { %v662_v32 = vpop.xlane.xlu0 %661 }
 0x550   :  { %3274 = vrcp.f32 %v662_v32 }
 0x553   :  { %v668_v34 = vpop.xlane.xlu0 %667 }
 0x554   :  { %3276 = vrcp.f32 %v668_v34 }
 0x557   :  { %v986_v36 = vpop.permute.xlu0 %985 }
 0x558   :  { %v991_v39 = vsel %vm701_vm7, %v986_v36, 0 }
 0x55a   :  { %v3275_v35 = vpop.eup %3274 }
 0x55b   :  { %v684_v56 = vmul.f32 %v3275_v35, %v3603_v60 }
 0x55d   :  { %v671_v33 = vpop.xlane.xlu1 %670  ;;  %v692_v37 = vpack.c.bf16 %v684_v56, %v684_v56 }
 0x55e   :  { %v3277_v38 = vpop.eup %3276  ;;  %3278 = vrcp.f32 %v671_v33 }
 0x55f   :  { %3012 = vmatmul.mubr.msk.bf16.vlgmr.msra.gmra.mrb[28].mxu1 %vm189_vm6, %v692_v37  ;;  %v686_v40 = vmul.f32 %v3277_v38, %v3607_v7 }
 0x560   :  { %3022 = vmatpush3.bf16.msra.mxu1 %v991_v39  ;;  %3023 = vmatprep.mubr.msk.bf16.mxu1 %vm3353_vm1, %v3352_v15  ;;  %v2780_v39 = vld [vmem:[%s4066_s5 + $0x3] ss:$0 sm:$0xff] }
 0x561   :  { %v1034_v41 = vpop.permute.xlu1 %1033  ;;  %3033 = vmatprep.subr.bf16.mxu1 %v3352_v15  ;;  %v694_v2 = vpack.c.bf16 %v686_v40, %v686_v40 }
 0x562   :  { %v1039_v42 = vsel %vm701_vm7, %v1034_v41, 0  ;;  %vm2730_vm7 = vcmask 1045509  }
 0x563   :  { %3028 = vmatpush3.bf16.msra.mxu0 %v1039_v42 }
 0x564   :  { %3041 = vmatprep.subr.bf16.mxu0 %v3352_v15 }
 0x567   :  { %3024 = vmatmul.mubr.msk.bf16.vlgmr.msra.gmra.mrb[32].mxu1 %vm189_vm6, %v694_v2 }
 0x568   :  { %v3279_v43 = vpop.eup %3278  ;;  %3037 = vmatprep.mubr.msk.bf16.mxu1 %vm3353_vm1, %v3352_v15  ;;  %3034 = vmatpush3.bf16.msra.mxu1 %v3226_v12 }
 0x569   :  { %v687_v44 = vmul.f32 %v3279_v43, %v3612_v10  ;;  %3035 = vmatprep.subr.bf16.mxu1 %v3352_v15 }
 0x56b   :  { %v695_v45 = vpack.c.bf16 %v687_v44, %v687_v44 }
 0x56c   :  { %3036 = vmatpush3.bf16.msra.mxu1 %v3227_v19 }
 0x56d   :  { %3030 = vmatmul.mubr.msk.bf16.vlgmr.msra.gmra.mrb[28].mxu0 %vm189_vm6, %v695_v45 }
 0x56e   :  { %3045 = vmatprep.mubr.msk.bf16.mxu0 %vm3353_vm1, %v3352_v15 }
 0x5a4   :  { %v739_v46 = vpop.f32.mrb[20].mxu1 }
 0x5a5   :  { %v2989_v47 = vpop.f32.mrb[21].mxu1 }
 0x5a6   :  { %v742_v48 = vpop.f32.mrb[22].mxu1 }
 0x5a7   :  { %v2990_v50 = vpop.f32.mrb[23].mxu1 }
 0x5d7   :  { %v787_v51 = vpop.f32.mrb[16].mxu0 }
 0x5d8   :  { %v2995_v53 = vpop.f32.mrb[17].mxu0 }
 0x5d9   :  { %v790_v55 = vpop.f32.mrb[18].mxu0 }
 0x5da   :  { %v2996_v57 = vpop.f32.mrb[19].mxu0 }
 0x5fd   :  { %v835_v58 = vpop.f32.mrb[24].mxu1 }
 0x5fe   :  { %v3001_v60 = vpop.f32.mrb[25].mxu1 }
 0x5ff   :  { %v838_v61 = vpop.f32.mrb[26].mxu1 }
 0x600   :  { %v3002_v3 = vpop.f32.mrb[27].mxu1 }
 0x601   :  { %v3228_v3 = vld [vmem:[%s4064_s3 + $0xc] ss:$24 sps:$4 sm:$0xff]  }
 0x602   :  { %3049 = vmatprep.subr.bf16.mxu1 %v3228_v3 }
 0x60c   :  { %v883_v5 = vpop.f32.mrb[20].mxu0 }
 0x60d   :  { %v3194_v6 = vpack.i.bf16 %v883_v5, %v835_v58  ;;  %v3007_v7 = vpop.f32.mrb[21].mxu0  ;;  %v3229_v5 = vld [vmem:[%s4064_s3 + $0x3c] ss:$24 sps:$4 sm:$0xff]  }
 0x60e   :  { %v886_v59 = vpop.f32.mrb[22].mxu0  ;;  %v28_v7 = vld [vmem:[%s4061_s0 + $0x18] sm:$0xff] }
 0x60f   :  { %v3008_v62 = vpop.f32.mrb[23].mxu0  ;;  %3195 = vrot.lane.b32.xlu0 %v3194_v6, %s3359_s17  ;;  %v27_v6 = vld [vmem:[%s4061_s0 + $0x10] sm:$0xff] }
 0x610   :  { %v1314_v59 = vpack.c.bf16 %v28_v7, %v27_v6  ;;  %v29_v62 = vld [vmem:[%s4061_s0 + $0x20] sm:$0xff] }
 0x614   :  { %v979_v8 = vpop.f32.mrb[24].mxu0 }
 0x615   :  { %v3019_v9 = vpop.f32.mrb[25].mxu0 }
 0x616   :  { %v982_v10 = vpop.f32.mrb[26].mxu0 }
 0x617   :  { %v3020_v11 = vpop.f32.mrb[27].mxu0  ;;  %v3230_v10 = vld [vmem:[%s4064_s3 + $0x8] ss:$24 sps:$4 sm:$0xff]  }
 0x618   :  { %3042 = vmatpush3.bf16.msra.mxu0 %v3230_v10  ;;  %v3231_v11 = vld [vmem:[%s4064_s3 + $0x38] ss:$24 sps:$4 sm:$0xff]  }
 0x619   :  { %3043 = vmatprep.subr.bf16.mxu0 %v3352_v15 }
 0x61c   :  { %3044 = vmatpush3.bf16.msra.mxu0 %v3231_v11 }
 0x61d   :  { %3057 = vmatprep.subr.bf16.mxu0 %v3352_v15 }
 0x632   :  { %v931_v13 = vpop.f32.mrb[28].mxu1 }
 0x633   :  { %v3199_v14 = vpack.i.bf16 %v979_v8, %v931_v13  ;;  %v3013_v16 = vpop.f32.mrb[29].mxu1  ;;  %v30_v8 = vld [vmem:[%s4061_s0 + $0x28] sm:$0xff] }
 0x634   :  { %v934_v17 = vpop.f32.mrb[30].mxu1  ;;  %v1315_v9 = vpack.c.bf16 %v30_v8, %v29_v62 }
 0x635   :  { %3200 = vrot.lane.b32.xlu1 %v3199_v14, %s3360_s20  ;;  %v3014_v18 = vpop.f32.mrb[31].mxu1 }
 0x63a   :  { %v1027_v20 = vpop.f32.mrb[32].mxu1 }
 0x63b   :  { %v3025_v63 = vpop.f32.mrb[33].mxu1 }
 0x63c   :  { %v1030_v4 = vpop.f32.mrb[34].mxu1 }
 0x63d   :  { %v3026_v22 = vpop.f32.mrb[35].mxu1 }
 0x640   :  { %v1075_v23 = vpop.f32.mrb[28].mxu0 }
 0x641   :  { %v3204_v24 = vpack.i.bf16 %v1075_v23, %v1027_v20  ;;  %v3031_v25 = vpop.f32.mrb[29].mxu0 }
 0x642   :  { %v1078_v27 = vpop.f32.mrb[30].mxu0 }
 0x643   :  { %v3032_v28 = vpop.f32.mrb[31].mxu0  ;;  %3205 = vrot.lane.b32.xlu0 %v3204_v24, %s3361_s23 }
 0x681   :  { %v3196_v29 = vpop.permute.xlu0 %3195 }
 0x682   :  { %v3198_v49 = vunpack.i.h.bf16 %v3196_v29  ;;  %v3197_v54 = vunpack.i.l.bf16 %v3196_v29  ;;  %v2784_v29 = vld [vmem:[%s4066_s5 + $0x4] ss:$0 sm:$0xff] }
 0x684   :  { %v1106_v31 = vsel %vm189_vm6, %v787_v51, %v3198_v49  ;;  %v1105_v32 = vsel %vm189_vm6, %v739_v46, %v3197_v54 }
 0x6a7   :  { %v3201_v52 = vpop.permute.xlu1 %3200 }
 0x6a8   :  { %v3203_v26 = vunpack.i.h.bf16 %v3201_v52  ;;  %v3202_v30 = vunpack.i.l.bf16 %v3201_v52 }
 0x6aa   :  { %v1109_v56 = vsel %vm1107_vm8, %v1106_v31, %v3203_v26  ;;  %v1108_v36 = vsel %vm1107_vm8, %v1105_v32, %v3202_v30 }
 0x6b5   :  { %v3206_v21 = vpop.permute.xlu0 %3205 }
 0x6b6   :  { %v3208_v34 = vunpack.i.h.bf16 %v3206_v21  ;;  %v3207_v35 = vunpack.i.l.bf16 %v3206_v21  ;;  %v2785_v21 = vld [vmem:[%s4066_s5 + $0x5] ss:$0 sm:$0xff] }
 0x6b8   :  { %v1112_v33 = vsel %vm1110_vm9, %v1109_v56, %v3208_v34  ;;  %v1111_v37 = vsel %vm1110_vm9, %v1108_v36, %v3207_v35  ;;  %v2790_v56 = vld [vmem:[%s4066_s5 + $0x7] ss:$0 sm:$0xff] }
 0x6b9   :  { %v1118_v38 = vpack.c.bf16 %v1112_v33, %v1111_v37 }
 0x6bb   :  { %3038 = vmatmul.mubr.msk.bf16.vlgmr.msra.gmra.mrb[36].mxu1 %vm42_vm0, %v1118_v38 }
 0x6bc   :  { %3050 = vmatpush3.bf16.msra.mxu1 %v3228_v3  ;;  %3053 = vmatprep.mubr.msk.bf16.mxu1 %vm42_vm0, %v1314_v59 }
 0x6bd   :  { %3051 = vmatprep.subr.bf16.mxu1 %v3229_v5 }
 0x6c0   :  { %3052 = vmatpush3.bf16.msra.mxu1 %v3229_v5 }
 0x6c1   :  { %3063 = vmatprep.subr.bf16.mxu1 %v3352_v15 }
 0x6c3   :  { %3054 = vmatmul.mubr.msk.bf16.vlgmr.msra.gmra.mrb[40].mxu1 %vm42_vm0, %v1315_v9 }
 0x6c4   :  { %3065 = vmatprep.mubr.msk.bf16.mxu1 %vm3353_vm1, %v3352_v15 }
 0x78e   :  { %v1174_v40 = vpop.f32.mrb[36].mxu1 }
 0x78f   :  { %v1175_v41 = vadd.f32 %v2780_v39, %v1174_v40  ;;  %v3039_v42 = vpop.f32.mrb[37].mxu1 }
 0x790   :  { %v1177_v2 = vpop.f32.mrb[38].mxu1 }
 0x791   :  { %v3684_v43 = vadd.f32 %v1175_v41, %v3403_v0  ;;  %v1178_v44 = vadd.f32 %v2780_v39, %v1177_v2  ;;  %v3040_v45 = vpop.f32.mrb[39].mxu1 }
 0x793   :  { %v3687_v46 = vadd.f32 %v1178_v44, %v3408_v1  ;;  %v1185_v47 = vsel %vm42_vm0, %v3684_v43, 0.0 }
 0x794   :  { %1186 = vadd.xlane.f32.xlu1 %v1185_v47 }
 0x795   :  { %v1188_v48 = vsel %vm42_vm0, %v3687_v46, 0.0 }
 0x796   :  { %1189 = vadd.xlane.f32.xlu0 %v1188_v48  ;;  %v3055_v36 = vpop.f32.mrb[40].mxu1  ;;  %v2786_v48 = vld [vmem:[%s4066_s5 + $0x6] ss:$0 sm:$0xff] }
 0x797   :  { %v1383_v33 = vadd.f32 %v3055_v36, %v2790_v56  ;;  %v1374_v37 = vpop.f32.mrb[41].mxu1 }
 0x798   :  { %v1375_v38 = vadd.f32 %v2790_v56, %v1374_v37  ;;  %v3056_v39 = vpop.f32.mrb[42].mxu1 }
 0x799   :  { %v1386_v40 = vadd.f32 %v3056_v39, %v2790_v56  ;;  %v1377_v41 = vpop.f32.mrb[43].mxu1 }
 0x79a   :  { %v1378_v42 = vadd.f32 %v2790_v56, %v1377_v41 }
 0x79b   :  { %v3740_v2 = vpack.c.bf16 %v1386_v40, %v1383_v33 }
 0x79c   :  { %v1407_v44 = vpack.c.bf16 %v1378_v42, %v1375_v38  ;;  %v2808_v38 = vld [vmem:[%s4063_s2 + $0x3] ss:$0 sm:$0xff] }
 0x79d   :  { %v1473_v45 = vsel %vm189_vm6, %v3740_v2, 0 }
 0x79e   :  { %v1427_v47 = vsel %vm189_vm6, %v1407_v44, 0  ;;  %3064 = vmatpush3.bf16.xpose.msra.mxu1 %v1473_v45 }
 0x79f   :  { %3075 = vmatprep.subr.bf16.mxu1 %v3352_v15 }
 0x7a5   :  { %1411 = vrot.lane.b32.xlu1 %v1407_v44, %s3354_s11 }
 0x7a9   :  { %1415 = vrot.lane.b32.xlu1 %v1407_v44, %s3356_s13 }
 0x821   :  { %v1187_v50 = vpop.xlane.xlu1 %1186 }
 0x822   :  { %v1191_v51 = vmul.f32 0.03125, %v1187_v50 }
 0x823   :  { %v1190_v53 = vpop.xlane.xlu0 %1189 }
 0x824   :  { %v1193_v55 = vsub.f32 %v3684_v43, %v1191_v51  ;;  %v1192_v0 = vmul.f32 0.03125, %v1190_v53 }
 0x826   :  { %v1194_v57 = vsub.f32 %v3687_v46, %v1192_v0  ;;  %v1195_v58 = vmul.f32 %v1193_v55, %v1193_v55  ;;  %v1211_v49 = vmul.f32 %v2784_v29, %v1193_v55  ;;  %v3756_v0 = vpop.permute.xlu1 %1411 }
 0x828   :  { %v1197_v1 = vsel %vm42_vm0, %v1195_v58, 0.0  ;;  %v1196_v60 = vmul.f32 %v1194_v57, %v1194_v57  ;;  %v1212_v54 = vmul.f32 %v2784_v29, %v1194_v57 }
 0x829   :  { %1198 = vadd.xlane.f32.xlu0 %v1197_v1 }
 0x82a   :  { %v1200_v61 = vsel %vm42_vm0, %v1196_v60, 0.0  ;;  %v1519_v60 = vsel %vm189_vm6, %v3756_v0, 0  ;;  %v3782_v6 = vpop.permute.xlu1 %1415 }
 0x82b   :  { %v1611_v62 = vsel %vm189_vm6, %v3782_v6, 0 }
 0x82d   :  { %1201 = vadd.xlane.f32.xlu0 %v1200_v61 }
 0x843   :  { %1413 = vrot.lane.b32.xlu0 %v3740_v2, %s3354_s11 }
 0x847   :  { %1417 = vrot.lane.b32.xlu0 %v3740_v2, %s3356_s13 }
 0x8b6   :  { %v1199_v12 = vpop.xlane.xlu0 %1198 }
 0x8b7   :  { %v1203_v13 = vmul.f32 0.032258064, %v1199_v12 }
 0x8b9   :  { %3280 = vrsqrt.f32 %v1203_v13  ;;  %vm1215_vm10 = vcmp.eq.f32.partialorder %v1203_v13, inf  ;;  %v1218_v19 = vand.u32 2147483648, %v1203_v13  ;;  %vm1217_vm11 = vcmp.eq.f32.partialorder %v1203_v13, 0.0 }
 0x8ba   :  { %v1202_v14 = vpop.xlane.xlu0 %1201 }
 0x8bb   :  { %v1204_v16 = vmul.f32 0.032258064, %v1202_v14 }
 0x8bd   :  { %3282 = vrsqrt.f32 %v1204_v16  ;;  %vm1222_vm12 = vcmp.eq.f32.partialorder %v1204_v16, inf  ;;  %v1225_v24 = vand.u32 2147483648, %v1204_v16  ;;  %vm1224_vm13 = vcmp.eq.f32.partialorder %v1204_v16, 0.0 }
 0x8be   :  { %v3760_v61 = vpop.permute.xlu0 %1413 }
 0x8bf   :  { %v1565_v5 = vsel %vm189_vm6, %v3760_v61, 0 }
 0x8c2   :  { %v3784_v7 = vpop.permute.xlu0 %1417 }
 0x8c3   :  { %v3281_v17 = vpop.eup %3280  ;;  %v1657_v10 = vsel %vm189_vm6, %v3784_v7, 0 }
 0x8c4   :  { %v1214_v18 = vmul.f32 %v3281_v17, %v1203_v13 }
 0x8c6   :  { %v1216_v20 = vsel %vm1215_vm10, %v1203_v13, %v1214_v18 }
 0x8c7   :  { %v3283_v63 = vpop.eup %3282  ;;  %v1219_v4 = vsel %vm1217_vm11, %v1218_v19, %v1216_v20 }
 0x8c8   :  { %v1227_v22 = vadd.f32 1e-06, %v1219_v4  ;;  %v1221_v23 = vmul.f32 %v3283_v63, %v1204_v16  ;;  %v2805_v63 = vld [vmem:[%s4063_s2] ss:$0 sm:$0xff] }
 0x8ca   :  { %3284 = vrcp.f32 %v1227_v22  ;;  %v1223_v25 = vsel %vm1222_vm12, %v1204_v16, %v1221_v23 }
 0x8cb   :  { %v1226_v27 = vsel %vm1224_vm13, %v1225_v24, %v1223_v25  ;;  %v2806_v25 = vld [vmem:[%s4063_s2 + $0x1] ss:$0 sm:$0xff] }
 0x8cc   :  { %v1228_v28 = vadd.f32 1e-06, %v1226_v27 }
 0x8ce   :  { %3286 = vrcp.f32 %v1228_v28 }
 0x8d4   :  { %v3285_v52 = vpop.eup %3284 }
 0x8d5   :  { %v1230_v26 = vmul.f32 %v3285_v52, %v1211_v49 }
 0x8d7   :  { %v1239_v32 = vadd.f32 %v2785_v21, %v1230_v26 }
 0x8d8   :  { %v3287_v30 = vpop.eup %3286 }
 0x8d9   :  { %v1232_v31 = vmul.f32 %v3287_v30, %v1212_v54 }
 0x8db   :  { %v1240_v34 = vadd.f32 %v2785_v21, %v1232_v31 }
 0x8dd   :  { %v1246_v35 = vpack.c.bf16 %v1240_v34, %v1239_v32  ;;  %v2807_v32 = vld [vmem:[%s4063_s2 + $0x2] ss:$0 sm:$0xff] }
 0x8df   :  { %3046 = vmatmul.mubr.msk.bf16.vlgmr.msra.gmra.mrb[32].mxu0 %vm42_vm0, %v1246_v35 }
 0x8e0   :  { %3059 = vmatprep.mubr.msk.bf16.mxu0 %vm3353_vm1, %v3352_v15  ;;  %3058 = vmatpush3.bf16.xpose.msra.mxu0 %v1427_v47 }
 0x8e1   :  { %3069 = vmatprep.subr.bf16.mxu0 %v3352_v15 }
 0x9b2   :  { %v1302_v50 = vpop.f32.mrb[32].mxu0 }
 0x9b3   :  { %v1303_v51 = vadd.f32 %v2786_v48, %v1302_v50  ;;  %v3047_v53 = vpop.f32.mrb[33].mxu0 }
 0x9b4   :  { %v1305_v55 = vpop.f32.mrb[34].mxu0 }
 0x9b5   :  { %v2839_v57 = vpack.c.bf16 %v1303_v51, %v1303_v51  ;;  %v1306_v58 = vadd.f32 %v2786_v48, %v1305_v55  ;;  %v3048_v1 = vpop.f32.mrb[35].mxu0  ;;  %v2809_v48 = vld [vmem:[%s4063_s2 + $0x4] ss:$0 sm:$0xff] }
 0x9b7   :  { %v2840_v3 = vpack.c.bf16 %v1306_v58, %v1306_v58  ;;  %1395 = vrot.lane.b32.xlu1 %v2839_v57, %s3354_s11  ;;  %3060 = vmatmul.mubr.msk.bf16.vlgmr.msra.gmra.mrb[36].mxu0 %vm189_vm6, %v2839_v57 }
 0x9b8   :  { %3070 = vmatpush3.bf16.xpose.msra.mxu0 %v1519_v60  ;;  %3071 = vmatprep.mubr.msk.bf16.mxu0 %vm3353_vm1, %v3352_v15  ;;  %v2810_v60 = vld [vmem:[%s4063_s2 + $0x5] ss:$0 sm:$0xff] }
 0x9b9   :  { %1401 = vrot.lane.b32.xlu0 %v2840_v3, %s3356_s13  ;;  %3066 = vmatmul.mubr.msk.bf16.vlgmr.msra.gmra.mrb[44].mxu1 %vm189_vm6, %v2840_v3 }
 0x9ba   :  { %3076 = vmatpush3.bf16.xpose.msra.mxu1 %v1565_v5  ;;  %3081 = vmatprep.subr.bf16.mxu0 %v3352_v15 }
 0x9bb   :  { %1397 = vrot.lane.b32.xlu1 %v2840_v3, %s3354_s11  ;;  %3077 = vmatprep.mubr.msk.bf16.mxu1 %vm3353_vm1, %v3352_v15 }
 0x9bc   :  { %3087 = vmatprep.subr.bf16.mxu1 %v3352_v15 }
 0x9bd   :  { %1421 = vrot.lane.b32.xlu0 %v3740_v2, %s3355_s12 }
 0x9bf   :  { %1399 = vrot.lane.b32.xlu1 %v2839_v57, %s3356_s13 }
 0x9c1   :  { %1405 = vrot.lane.b32.xlu0 %v2840_v3, %s3355_s12 }
 0x9c3   :  { %1419 = vrot.lane.b32.xlu1 %v1407_v44, %s3355_s12 }
 0x9c7   :  { %1403 = vrot.lane.b32.xlu1 %v2839_v57, %s3355_s12 }
 0x9cb   :  { %1951 = vrot.lane.b32.xlu1 %v1407_v44, %s3357_s14 }
 0xa29   :  { %v1396_v59 = vpop.permute.xlu1 %1395 }
 0xa2a   :  { %3072 = vmatmul.mubr.msk.bf16.vlgmr.msra.gmra.mrb[40].mxu0 %vm189_vm6, %v1396_v59 }
 0xa2b   :  { %3082 = vmatpush3.bf16.xpose.msra.mxu0 %v1611_v62  ;;  %3083 = vmatprep.mubr.msk.bf16.mxu0 %vm3353_vm1, %v3352_v15  ;;  %v1402_v8 = vpop.permute.xlu0 %1401 }
 0xa2c   :  { %3093 = vmatprep.subr.bf16.mxu0 %v3352_v15 }
 0xa2d   :  { %v1398_v9 = vpop.permute.xlu1 %1397 }
 0xa2e   :  { %3078 = vmatmul.mubr.msk.bf16.vlgmr.msra.gmra.mrb[48].mxu1 %vm189_vm6, %v1398_v9 }
 0xa2f   :  { %3088 = vmatpush3.bf16.xpose.msra.mxu1 %v1657_v10  ;;  %3089 = vmatprep.mubr.msk.bf16.mxu1 %vm3353_vm1, %v3352_v15  ;;  %v3799_v12 = vpop.permute.xlu0 %1421 }
 0xa30   :  { %3099 = vmatprep.subr.bf16.mxu1 %v3352_v15  ;;  %v1749_v14 = vsel %vm189_vm6, %v3799_v12, 0 }
 0xa31   :  { %v1400_v11 = vpop.permute.xlu1 %1399 }
 0xa32   :  { %3084 = vmatmul.mubr.msk.bf16.vlgmr.msra.gmra.mrb[44].mxu0 %vm189_vm6, %v1400_v11 }
 0xa33   :  { %3095 = vmatprep.mubr.msk.bf16.mxu0 %vm3353_vm1, %v3352_v15  ;;  %v1406_v18 = vpop.permute.xlu0 %1405 }
 0xa35   :  { %v3803_v13 = vpop.permute.xlu1 %1419 }
 0xa36   :  { %v1703_v16 = vsel %vm189_vm6, %v3803_v13, 0  ;;  %3090 = vmatmul.mubr.msk.bf16.vlgmr.msra.gmra.mrb[52].mxu1 %vm189_vm6, %v1402_v8 }
 0xa37   :  { %3100 = vmatpush3.bf16.xpose.msra.mxu1 %v1749_v14  ;;  %3094 = vmatpush3.bf16.xpose.msra.mxu0 %v1703_v16  ;;  %v2812_v16 = vld [vmem:[%s4063_s2 + $0x7] ss:$0 sm:$0xff] }
 0xa38   :  { %3101 = vmatprep.mubr.msk.bf16.mxu1 %vm3353_vm1, %v3352_v15  ;;  %3105 = vmatprep.subr.bf16.mxu0 %v3352_v15 }
 0xa39   :  { %v1404_v17 = vpop.permute.xlu1 %1403  ;;  %3111 = vmatprep.subr.bf16.mxu1 %v3352_v15 }
 0xa3d   :  { %v1952_v19 = vpop.permute.xlu1 %1951 }
 0xa3e   :  { %3096 = vmatmul.mubr.msk.bf16.vlgmr.msra.gmra.mrb[48].mxu0 %vm189_vm6, %v1404_v17  ;;  %3102 = vmatmul.mubr.msk.bf16.vlgmr.msra.gmra.mrb[56].mxu1 %vm189_vm6, %v1406_v18  ;;  %v2811_v17 = vld [vmem:[%s4063_s2 + $0x6] ss:$0 sm:$0xff] }
 0xa3f   :  { %3106 = vmatpush3.bf16.msra.mxu0 %v1952_v19  ;;  %3113 = vmatprep.mubr.msk.bf16.mxu1 %vm3353_vm1, %v3352_v15 }
 0xa40   :  { %3107 = vmatprep.mubr.msk.bf16.mxu0 %vm3353_vm1, %v3352_v15  ;;  %3117 = vmatprep.subr.bf16.mxu0 %v3352_v15 }
 0xa8a   :  { %v1463_v20 = vpop.f32.mrb[36].mxu0 }
 0xa8b   :  { %v1791_v4 = vmul.f32 0.35355338, %v1463_v20  ;;  %v3061_v22 = vpop.f32.mrb[37].mxu0 }
 0xa8c   :  { %v1466_v23 = vpop.f32.mrb[38].mxu0  ;;  %v1509_v24 = vpop.f32.mrb[44].mxu1 }
 0xa8d   :  { %v1792_v27 = vmul.f32 0.35355338, %v1509_v24  ;;  %v3062_v28 = vpop.f32.mrb[39].mxu0  ;;  %v3067_v29 = vpop.f32.mrb[45].mxu1  ;;  %v3827_v52 = vadd.f32 %v2805_v63, %v1791_v4 }
 0xa8e   :  { %v1512_v49 = vpop.f32.mrb[46].mxu1 }
 0xa8f   :  { %v3068_v54 = vpop.f32.mrb[47].mxu1  ;;  %v1855_v26 = vsel %vm1107_vm8, %v3827_v52, -inf  ;;  %v3831_v30 = vadd.f32 %v2806_v25, %v1792_v27 }
 0xa90   :  { %1856 = vmax.xlane.f32.xlu1 %v1855_v26 }
 0xa91   :  { %v1858_v21 = vsel %vm1107_vm8, %v3831_v30, -inf }
 0xa92   :  { %1859 = vmax.xlane.f32.xlu0 %v1858_v21 }
 0xafd   :  { %v1555_v31 = vpop.f32.mrb[40].mxu0 }
 0xafe   :  { %v1793_v34 = vmul.f32 0.35355338, %v1555_v31  ;;  %v3073_v35 = vpop.f32.mrb[41].mxu0 }
 0xaff   :  { %v1558_v56 = vpop.f32.mrb[42].mxu0 }
 0xb00   :  { %v3074_v36 = vpop.f32.mrb[43].mxu0  ;;  %v3838_v33 = vadd.f32 %v2807_v32, %v1793_v34 }
 0xb01   :  { %v1601_v37 = vpop.f32.mrb[48].mxu1 }
 0xb02   :  { %v1794_v39 = vmul.f32 0.35355338, %v1601_v37  ;;  %v3079_v40 = vpop.f32.mrb[49].mxu1  ;;  %v1861_v41 = vsel %vm1107_vm8, %v3838_v33, -inf }
 0xb03   :  { %v1604_v42 = vpop.f32.mrb[50].mxu1  ;;  %1862 = vmax.xlane.f32.xlu0 %v1861_v41 }
 0xb04   :  { %v3080_v44 = vpop.f32.mrb[51].mxu1  ;;  %v3845_v45 = vadd.f32 %v2808_v38, %v1794_v39 }
 0xb05   :  { %v1647_v47 = vpop.f32.mrb[44].mxu0 }
 0xb06   :  { %v1795_v50 = vmul.f32 0.35355338, %v1647_v47  ;;  %v3085_v51 = vpop.f32.mrb[45].mxu0  ;;  %v1864_v53 = vsel %vm1107_vm8, %v3845_v45, -inf }
 0xb07   :  { %1865 = vmax.xlane.f32.xlu0 %v1864_v53  ;;  %v1650_v55 = vpop.f32.mrb[46].mxu0 }
 0xb08   :  { %v3086_v57 = vpop.f32.mrb[47].mxu0  ;;  %v1851_v58 = vadd.f32 %v2809_v48, %v1795_v50 }
 0xb09   :  { %v1693_v1 = vpop.f32.mrb[52].mxu1 }
 0xb0a   :  { %v1796_v3 = vmul.f32 0.35355338, %v1693_v1  ;;  %v3091_v5 = vpop.f32.mrb[53].mxu1  ;;  %v1867_v59 = vsel %vm1107_vm8, %v1851_v58, -inf }
 0xb0b   :  { %v1696_v62 = vpop.f32.mrb[54].mxu1  ;;  %1868 = vmax.xlane.f32.xlu1 %v1867_v59 }
 0xb0c   :  { %v3092_v8 = vpop.f32.mrb[55].mxu1  ;;  %v3856_v9 = vadd.f32 %v2810_v60, %v1796_v3 }
 0xb0e   :  { %v1870_v10 = vsel %vm1107_vm8, %v3856_v9, -inf }
 0xb0f   :  { %1871 = vmax.xlane.f32.xlu0 %v1870_v10 }
 0xb11   :  { %v1739_v11 = vpop.f32.mrb[48].mxu0  ;;  %v1785_v14 = vpop.f32.mrb[56].mxu1 }
 0xb12   :  { %v1797_v18 = vmul.f32 0.35355338, %v1739_v11  ;;  %v1798_v19 = vmul.f32 0.35355338, %v1785_v14  ;;  %v3097_v20 = vpop.f32.mrb[49].mxu0  ;;  %v3103_v63 = vpop.f32.mrb[57].mxu1 }
 0xb13   :  { %v1742_v4 = vpop.f32.mrb[50].mxu0  ;;  %v1788_v22 = vpop.f32.mrb[58].mxu1 }
 0xb14   :  { %v3098_v23 = vpop.f32.mrb[51].mxu0  ;;  %v3104_v24 = vpop.f32.mrb[59].mxu1  ;;  %v3866_v25 = vadd.f32 %v2812_v16, %v1798_v19  ;;  %v1853_v27 = vadd.f32 %v2811_v17, %v1797_v18 }
 0xb16   :  { %v1876_v28 = vsel %vm1107_vm8, %v3866_v25, -inf  ;;  %v1873_v29 = vsel %vm1107_vm8, %v1853_v27, -inf }
 0xb17   :  { %1877 = vmax.xlane.f32.xlu0 %v1876_v28  ;;  %1874 = vmax.xlane.f32.xlu1 %v1873_v29 }
 0xb1d   :  { %v1857_v26 = vpop.xlane.xlu1 %1856 }
 0xb1e   :  { %v1879_v21 = vsub.f32 %v3827_v52, %v1857_v26 }
 0xb1f   :  { %v1860_v49 = vpop.xlane.xlu0 %1859 }
 0xb20   :  { %v1880_v54 = vsub.f32 %v3831_v30, %v1860_v49  ;;  %v1887_v32 = vmul.f32 1.442695, %v1879_v21 }
 0xb22   :  { %v1889_v31 = vmul.f32 1.442695, %v1880_v54 }
 0xb24   :  { %3288 = vpow2.f32 %v1889_v31 }
 0xb25   :  { %3290 = vpow2.f32 %v1887_v32 }
 0xb28   :  { %2043 = vrot.lane.b32.xlu1 %v3756_v0, %s3357_s14 }
 0xb2c   :  { %2089 = vrot.lane.b32.xlu1 %v3760_v61, %s3357_s14 }
 0xb2d   :  { %1997 = vrot.lane.b32.xlu0 %v3740_v2, %s3357_s14 }
 0xb2e   :  { %v3289_v34 = vpop.eup %3288 }
 0xb2f   :  { %v1906_v35 = vsel %vm1107_vm8, %v3289_v34, 0.0  ;;  %v3291_v0 = vpop.eup %3290 }
 0xb30   :  { %v1903_v61 = vsel %vm1107_vm8, %v3291_v0, 0.0 }
 0xb4c   :  { %1907 = vadd.xlane.f32.xlu0 %v1906_v35 }
 0xb50   :  { %1904 = vadd.xlane.f32.xlu1 %v1903_v61 }
 0xb61   :  { %2135 = vrot.lane.b32.xlu1 %v3782_v6, %s3357_s14 }
 0xb90   :  { %v1863_v2 = vpop.xlane.xlu0 %1862 }
 0xb91   :  { %v1881_v30 = vsub.f32 %v3838_v33, %v1863_v2 }
 0xb93   :  { %v1891_v56 = vmul.f32 1.442695, %v1881_v30 }
 0xb94   :  { %v1866_v52 = vpop.xlane.xlu0 %1865 }
 0xb95   :  { %3292 = vpow2.f32 %v1891_v56  ;;  %v1882_v36 = vsub.f32 %v3845_v45, %v1866_v52 }
 0xb97   :  { %v1893_v37 = vmul.f32 1.442695, %v1882_v36 }
 0xb98   :  { %v1869_v38 = vpop.xlane.xlu1 %1868 }
 0xb99   :  { %3294 = vpow2.f32 %v1893_v37  ;;  %v1883_v39 = vsub.f32 %v1851_v58, %v1869_v38 }
 0xb9b   :  { %v1895_v40 = vmul.f32 1.442695, %v1883_v39 }
 0xb9c   :  { %v1872_v42 = vpop.xlane.xlu0 %1871 }
 0xb9d   :  { %3296 = vpow2.f32 %v1895_v40  ;;  %v1884_v1 = vsub.f32 %v3856_v9, %v1872_v42 }
 0xb9f   :  { %v3885_v41 = vpop.eup %3292  ;;  %v1897_v60 = vmul.f32 1.442695, %v1884_v1 }
 0xba0   :  { %v1909_v6 = vsel %vm1107_vm8, %v3885_v41, 0.0 }
 0xba1   :  { %1910 = vadd.xlane.f32.xlu1 %v1909_v6 }
 0xba3   :  { %v3889_v44 = vpop.eup %3294 }
 0xba4   :  { %v1878_v33 = vpop.xlane.xlu0 %1877  ;;  %v1875_v47 = vpop.xlane.xlu1 %1874  ;;  %v1912_v45 = vsel %vm1107_vm8, %v3889_v44, 0.0 }
 0xba5   :  { %v1885_v48 = vsub.f32 %v1853_v27, %v1875_v47  ;;  %1913 = vadd.xlane.f32.xlu0 %v1912_v45  ;;  %v1886_v3 = vsub.f32 %v3866_v25, %v1878_v33 }
 0xba7   :  { %v3893_v50 = vpop.eup %3296  ;;  %v1899_v51 = vmul.f32 1.442695, %v1885_v48  ;;  %v1901_v5 = vmul.f32 1.442695, %v1886_v3 }
 0xba8   :  { %v1998_v53 = vpop.permute.xlu0 %1997  ;;  %v1915_v55 = vsel %vm1107_vm8, %v3893_v50, 0.0  ;;  %v2044_v59 = vpop.permute.xlu1 %2043 }
 0xba9   :  { %3112 = vmatpush3.bf16.msra.mxu1 %v1998_v53  ;;  %1916 = vadd.xlane.f32.xlu1 %v1915_v55  ;;  %3298 = vpow2.f32 %v1899_v51 }
 0xbaa   :  { %3123 = vmatprep.subr.bf16.mxu1 %v3352_v15  ;;  %3300 = vpow2.f32 %v1897_v60 }
 0xbab   :  { %3302 = vpow2.f32 %v1901_v5 }
 0xbac   :  { %v2090_v8 = vpop.permute.xlu1 %2089 }
 0xbb3   :  { %v3898_v57 = vpop.eup %3298 }
 0xbb4   :  { %v1921_v58 = vsel %vm1107_vm8, %v3898_v57, 0.0  ;;  %v3908_v62 = vpop.eup %3300 }
 0xbb5   :  { %1922 = vadd.xlane.f32.xlu1 %v1921_v58  ;;  %v1918_v11 = vsel %vm1107_vm8, %v3908_v62, 0.0 }
 0xbbb   :  { %2181 = vrot.lane.b32.xlu0 %v3784_v7, %s3357_s14  ;;  %v3912_v7 = vpop.eup %3302 }
 0xbc6   :  { %2227 = vrot.lane.b32.xlu1 %v3803_v13, %s3357_s14  ;;  %v1924_v13 = vsel %vm1107_vm8, %v3912_v7, 0.0 }
 0xbd9   :  { %v1908_v10 = vpop.xlane.xlu0 %1907 }
 0xbda   :  { %3304 = vrcp.f32 %v1908_v10  ;;  %1919 = vadd.xlane.f32.xlu0 %v1918_v11 }
 0xbdd   :  { %v1905_v9 = vpop.xlane.xlu1 %1904 }
 0xbde   :  { %3306 = vrcp.f32 %v1905_v9  ;;  %1925 = vadd.xlane.f32.xlu0 %v1924_v13  ;;  %v3232_v9 = vld [vmem:[%s4064_s3 + $0x10] ss:$24 sps:$4 sm:$0xff]   ;;  %v3233_v13 = vld [vmem:[%s4064_s3 + $0x40] ss:$24 sps:$4 sm:$0xff]  }
 0xbe1   :  { %v2136_v63 = vpop.permute.xlu1 %2135 }
 0xbe4   :  { %v3305_v14 = vpop.eup %3304 }
 0xbe5   :  { %v1936_v16 = vmul.f32 %v3305_v14, %v3289_v34 }
 0xbe7   :  { %v1944_v17 = vpack.c.bf16 %v1936_v16, %v1936_v16 }
 0xbe8   :  { %v3307_v18 = vpop.eup %3306 }
 0xbe9   :  { %v1935_v19 = vmul.f32 %v3307_v18, %v3291_v0  ;;  %3114 = vmatmul.mubr.msk.bf16.vlgmr.msra.gmra.mrb[60].mxu1 %vm1107_vm8, %v1944_v17 }
 0xbea   :  { %3124 = vmatpush3.bf16.msra.mxu1 %v2090_v8  ;;  %3125 = vmatprep.mubr.msk.bf16.mxu1 %vm3353_vm1, %v3352_v15 }
 0xbeb   :  { %v1943_v20 = vpack.c.bf16 %v1935_v19, %v1935_v19  ;;  %3135 = vmatprep.subr.bf16.mxu1 %v3352_v15 }
 0xbed   :  { %3108 = vmatmul.mubr.msk.bf16.vlgmr.msra.gmra.mrb[52].mxu0 %vm1107_vm8, %v1943_v20 }
 0xbee   :  { %3118 = vmatpush3.bf16.msra.mxu0 %v2044_v59  ;;  %3119 = vmatprep.mubr.msk.bf16.mxu0 %vm3353_vm1, %v3352_v15 }
 0xbef   :  { %3129 = vmatprep.subr.bf16.mxu0 %v3352_v15 }
 0xbf4   :  { %2273 = vrot.lane.b32.xlu0 %v3799_v12, %s3357_s14 }
 0xc2e   :  { %v1911_v4 = vpop.xlane.xlu1 %1910 }
 0xc2f   :  { %3308 = vrcp.f32 %v1911_v4 }
 0xc32   :  { %v1914_v22 = vpop.xlane.xlu0 %1913 }
 0xc33   :  { %3310 = vrcp.f32 %v1914_v22 }
 0xc36   :  { %v1917_v23 = vpop.xlane.xlu1 %1916  ;;  %v2182_v54 = vpop.permute.xlu0 %2181 }
 0xc37   :  { %3312 = vrcp.f32 %v1917_v23 }
 0xc39   :  { %v3309_v24 = vpop.eup %3308 }
 0xc3a   :  { %v1937_v25 = vmul.f32 %v3309_v24, %v3885_v41 }
 0xc3c   :  { %v1945_v27 = vpack.c.bf16 %v1937_v25, %v1937_v25 }
 0xc3d   :  { %v3311_v28 = vpop.eup %3310 }
 0xc3e   :  { %v1938_v29 = vmul.f32 %v3311_v28, %v3889_v44  ;;  %3120 = vmatmul.mubr.msk.bf16.vlgmr.msra.gmra.mrb[56].mxu0 %vm1107_vm8, %v1945_v27 }
 0xc3f   :  { %3130 = vmatpush3.bf16.msra.mxu0 %v2136_v63  ;;  %3131 = vmatprep.mubr.msk.bf16.mxu0 %vm3353_vm1, %v3352_v15 }
 0xc40   :  { %v1946_v12 = vpack.c.bf16 %v1938_v29, %v1938_v29  ;;  %3141 = vmatprep.subr.bf16.mxu0 %v3352_v15 }
 0xc41   :  { %v3313_v49 = vpop.eup %3312 }
 0xc42   :  { %v1939_v26 = vmul.f32 %v3313_v49, %v3893_v50  ;;  %3126 = vmatmul.mubr.msk.bf16.vlgmr.msra.gmra.mrb[64].mxu1 %vm1107_vm8, %v1946_v12  ;;  %v1923_v21 = vpop.xlane.xlu1 %1922 }
 0xc43   :  { %3136 = vmatpush3.bf16.msra.mxu1 %v2182_v54  ;;  %3137 = vmatprep.mubr.msk.bf16.mxu1 %vm3353_vm1, %v3352_v15  ;;  %3314 = vrcp.f32 %v1923_v21 }
 0xc44   :  { %v1947_v31 = vpack.c.bf16 %v1939_v26, %v1939_v26  ;;  %3147 = vmatprep.subr.bf16.mxu1 %v3352_v15 }
 0xc46   :  { %3132 = vmatmul.mubr.msk.bf16.vlgmr.msra.gmra.mrb[60].mxu0 %vm1107_vm8, %v1947_v31  ;;  %v2228_v32 = vpop.permute.xlu1 %2227 }
 0xc47   :  { %3143 = vmatprep.mubr.msk.bf16.mxu0 %vm3353_vm1, %v3352_v15  ;;  %3142 = vmatpush3.bf16.msra.mxu0 %v2228_v32 }
 0xc48   :  { %3153 = vmatprep.subr.bf16.mxu0 %v3352_v15 }
 0xc4d   :  { %v3315_v34 = vpop.eup %3314 }
 0xc4e   :  { %v1941_v35 = vmul.f32 %v3315_v34, %v3898_v57 }
 0xc50   :  { %v1949_v0 = vpack.c.bf16 %v1941_v35, %v1941_v35 }
 0xc52   :  { %3144 = vmatmul.mubr.msk.bf16.vlgmr.msra.gmra.mrb[64].mxu0 %vm1107_vm8, %v1949_v0 }
 0xc53   :  { %3157 = vmatprep.mubr.msk.bf16.mxu0 %vm3353_vm1, %v3352_v15  ;;  %3154 = vmatpush3.bf16.msra.mxu0 %v3232_v9 }
 0xc54   :  { %3155 = vmatprep.subr.bf16.mxu0 %v3352_v15 }
 0xc57   :  { %3156 = vmatpush3.bf16.msra.mxu0 %v3233_v13 }
 0xc58   :  { %3169 = vmatprep.subr.bf16.mxu0 %v3352_v15 }
 0xc67   :  { %v1920_v61 = vpop.xlane.xlu0 %1919 }
 0xc68   :  { %3316 = vrcp.f32 %v1920_v61 }
 0xc6b   :  { %v1926_v2 = vpop.xlane.xlu0 %1925 }
 0xc6c   :  { %3318 = vrcp.f32 %v1926_v2  ;;  %v2821_v2 = vld [vmem:[%s4066_s5 + $0x8] ss:$0 sm:$0xff] }
 0xc6f   :  { %v2274_v37 = vpop.permute.xlu0 %2273 }
 0xc72   :  { %v3317_v30 = vpop.eup %3316 }
 0xc73   :  { %v1940_v56 = vmul.f32 %v3317_v30, %v3908_v62 }
 0xc75   :  { %v1948_v52 = vpack.c.bf16 %v1940_v56, %v1940_v56 }
 0xc76   :  { %v3319_v36 = vpop.eup %3318 }
 0xc77   :  { %3138 = vmatmul.mubr.msk.bf16.vlgmr.msra.gmra.mrb[68].mxu1 %vm1107_vm8, %v1948_v52  ;;  %v1942_v38 = vmul.f32 %v3319_v36, %v3912_v7 }
 0xc78   :  { %3148 = vmatpush3.bf16.msra.mxu1 %v2274_v37  ;;  %3149 = vmatprep.mubr.msk.bf16.mxu1 %vm3353_vm1, %v3352_v15 }
 0xc79   :  { %3161 = vmatprep.subr.bf16.mxu1 %v3352_v15  ;;  %v1950_v39 = vpack.c.bf16 %v1942_v38, %v1942_v38 }
 0xc7f   :  { %3150 = vmatmul.mubr.msk.bf16.vlgmr.msra.gmra.mrb[72].mxu1 %vm1107_vm8, %v1950_v39 }
 0xc80   :  { %3165 = vmatprep.mubr.msk.bf16.mxu1 %vm3353_vm1, %v3352_v15 }
 0xcbc   :  { %v2037_v40 = vpop.f32.mrb[60].mxu1 }
 0xcbd   :  { %v3115_v41 = vpop.f32.mrb[61].mxu1 }
 0xcbe   :  { %v2040_v42 = vpop.f32.mrb[62].mxu1 }
 0xcbf   :  { %v3116_v6 = vpop.f32.mrb[63].mxu1 }
 0xcc0   :  { %v1991_v44 = vpop.f32.mrb[52].mxu0 }
 0xcc1   :  { %v3109_v33 = vpop.f32.mrb[53].mxu0 }
 0xcc2   :  { %v1994_v47 = vpop.f32.mrb[54].mxu0 }
 0xcc3   :  { %v3110_v45 = vpop.f32.mrb[55].mxu0 }
 0xd11   :  { %v2083_v48 = vpop.f32.mrb[56].mxu0 }
 0xd12   :  { %v3121_v50 = vpop.f32.mrb[57].mxu0 }
 0xd13   :  { %v2086_v51 = vpop.f32.mrb[58].mxu0 }
 0xd14   :  { %v3122_v53 = vpop.f32.mrb[59].mxu0 }
 0xd15   :  { %v2129_v55 = vpop.f32.mrb[64].mxu1  ;;  %v3234_v53 = vld [vmem:[%s4064_s3 + $0x14] ss:$24 sps:$4 sm:$0xff]  }
 0xd16   :  { %v3209_v57 = vpack.i.bf16 %v2129_v55, %v2083_v48  ;;  %v3127_v58 = vpop.f32.mrb[65].mxu1  ;;  %3162 = vmatpush3.bf16.msra.mxu1 %v3234_v53  ;;  %v3235_v55 = vld [vmem:[%s4064_s3 + $0x44] ss:$24 sps:$4 sm:$0xff]  }
 0xd17   :  { %v2132_v1 = vpop.f32.mrb[66].mxu1  ;;  %3163 = vmatprep.subr.bf16.mxu1 %v3352_v15  ;;  %v3237_v58 = vld [vmem:[%s4065_s4 + $0x8] sm:$0xff]  }
 0xd18   :  { %v3128_v60 = vpop.f32.mrb[67].mxu1  ;;  %3210 = vrot.lane.b32.xlu1 %v3209_v57, %s3359_s17  ;;  %v3236_v57 = vld [vmem:[%s4065_s4] sm:$0xff]  }
 0xd19   :  { %v2175_v3 = vpop.f32.mrb[60].mxu0 }
 0xd1a   :  { %v3133_v5 = vpop.f32.mrb[61].mxu0  ;;  %3164 = vmatpush3.bf16.msra.mxu1 %v3235_v55 }
 0xd1b   :  { %v2178_v59 = vpop.f32.mrb[62].mxu0 }
 0xd1c   :  { %v3134_v62 = vpop.f32.mrb[63].mxu0 }
 0xd25   :  { %v2267_v8 = vpop.f32.mrb[64].mxu0 }
 0xd26   :  { %v3145_v10 = vpop.f32.mrb[65].mxu0 }
 0xd27   :  { %v2270_v11 = vpop.f32.mrb[66].mxu0 }
 0xd28   :  { %v3146_v7 = vpop.f32.mrb[67].mxu0 }
 0xd4a   :  { %v2221_v14 = vpop.f32.mrb[68].mxu1 }
 0xd4b   :  { %v3214_v16 = vpack.i.bf16 %v2221_v14, %v2175_v3  ;;  %v3139_v17 = vpop.f32.mrb[69].mxu1 }
 0xd4c   :  { %v2224_v18 = vpop.f32.mrb[70].mxu1 }
 0xd4d   :  { %v3140_v19 = vpop.f32.mrb[71].mxu1  ;;  %3215 = vrot.lane.b32.xlu0 %v3214_v16, %s3360_s20 }
 0xd4e   :  { %v2825_v19 = vld [vmem:[%s4066_s5 + $0x9] ss:$0 sm:$0xff] }
 0xd52   :  { %v2313_v20 = vpop.f32.mrb[72].mxu1 }
 0xd53   :  { %v3219_v63 = vpack.i.bf16 %v2313_v20, %v2267_v8  ;;  %v3151_v4 = vpop.f32.mrb[73].mxu1 }
 0xd54   :  { %v2316_v22 = vpop.f32.mrb[74].mxu1 }
 0xd55   :  { %v3152_v23 = vpop.f32.mrb[75].mxu1  ;;  %3220 = vrot.lane.b32.xlu1 %v3219_v63, %s3361_s23 }
 0xd8a   :  { %v3211_v24 = vpop.permute.xlu1 %3210 }
 0xd8b   :  { %v3213_v27 = vunpack.i.h.bf16 %v3211_v24  ;;  %v3212_v28 = vunpack.i.l.bf16 %v3211_v24  ;;  %v2826_v24 = vld [vmem:[%s4066_s5 + $0xa] ss:$0 sm:$0xff] }
 0xd8d   :  { %v2344_v54 = vsel %vm189_vm6, %v2037_v40, %v3213_v27  ;;  %v2343_v26 = vsel %vm189_vm6, %v1991_v44, %v3212_v28  ;;  %vm2728_vm6 = vcmask 1043459  }
 0xdbf   :  { %v3216_v25 = vpop.permute.xlu0 %3215 }
 0xdc0   :  { %v3218_v29 = vunpack.i.h.bf16 %v3216_v25  ;;  %v3217_v12 = vunpack.i.l.bf16 %v3216_v25 }
 0xdc2   :  { %v2346_v32 = vsel %vm1107_vm8, %v2344_v54, %v3218_v29  ;;  %v2345_v34 = vsel %vm1107_vm8, %v2343_v26, %v3217_v12  ;;  %v3238_v12 = vld [vmem:[%s4065_s4 + $0x10] sm:$0xff]   ;;  %v2827_v54 = vld [vmem:[%s4066_s5 + $0xb] ss:$0 sm:$0xff] }
 0xdc7   :  { %v3221_v49 = vpop.permute.xlu1 %3220 }
 0xdc8   :  { %v3223_v21 = vunpack.i.h.bf16 %v3221_v49  ;;  %v3222_v31 = vunpack.i.l.bf16 %v3221_v49  ;;  %v3239_v49 = vld [vmem:[%s4065_s4 + $0x18] sm:$0xff]   ;;  %s3362_s4 = smov 32  }
 0xdca   :  { %v2348_v35 = vsel %vm1110_vm9, %v2346_v32, %v3223_v21  ;;  %v2347_v0 = vsel %vm1110_vm9, %v2345_v34, %v3222_v31 }
 0xdcb   :  { %v2354_v61 = vpack.c.bf16 %v2348_v35, %v2347_v0 }
 0xdcd   :  { %3158 = vmatmul.mubr.msk.bf16.vlgmr.msra.gmra.mrb[68].mxu0 %vm42_vm0, %v2354_v61 }
 0xdce   :  { %3177 = vmatprep.mubr.msk.bf16.mxu0 %vm3353_vm1, %v3352_v15  ;;  %3170 = vmatpush3.bf16.msra.mxu0 %v3236_v57 }
 0xdcf   :  { %3171 = vmatprep.subr.bf16.mxu0 %v3352_v15 }
 0xdd2   :  { %3172 = vmatpush3.bf16.msra.mxu0 %v3237_v58 }
 0xdd3   :  { %3173 = vmatprep.subr.bf16.mxu0 %v3352_v15 }
 0xdd6   :  { %3174 = vmatpush3.bf16.msra.mxu0 %v3238_v12 }
 0xdd7   :  { %3175 = vmatprep.subr.bf16.mxu0 %v3352_v15  ;;  %v2831_v15 = vld [vmem:[%s4066_s5 + $0xc] ss:$0 sm:$0xff]  ;;  %s3364_s5 = smov [#allocation2]  }
 0xdda   :  { %3176 = vmatpush3.bf16.msra.mxu0 %v3239_v49 }
 0xea0   :  { %v2410_v30 = vpop.f32.mrb[68].mxu0 }
 0xea1   :  { %v2411_v56 = vadd.f32 %v2821_v2, %v2410_v30  ;;  %v3159_v52 = vpop.f32.mrb[69].mxu0 }
 0xea2   :  { %v2413_v36 = vpop.f32.mrb[70].mxu0 }
 0xea3   :  { %v3978_v37 = vadd.f32 %v2411_v56, %v3684_v43  ;;  %v2414_v38 = vadd.f32 %v2821_v2, %v2413_v36  ;;  %v3160_v39 = vpop.f32.mrb[71].mxu0 }
 0xea5   :  { %v3981_v40 = vadd.f32 %v2414_v38, %v3687_v46  ;;  %v2421_v41 = vsel %vm42_vm0, %v3978_v37, 0.0 }
 0xea6   :  { %2422 = vadd.xlane.f32.xlu0 %v2421_v41 }
 0xea7   :  { %v2424_v42 = vsel %vm42_vm0, %v3981_v40, 0.0 }
 0xea8   :  { %2425 = vadd.xlane.f32.xlu1 %v2424_v42 }
 0xf33   :  { %v2423_v6 = vpop.xlane.xlu0 %2422 }
 0xf34   :  { %v2427_v44 = vmul.f32 0.03125, %v2423_v6 }
 0xf35   :  { %v2426_v33 = vpop.xlane.xlu1 %2425 }
 0xf36   :  { %v2429_v47 = vsub.f32 %v3978_v37, %v2427_v44  ;;  %v2428_v43 = vmul.f32 0.03125, %v2426_v33 }
 0xf38   :  { %v2430_v45 = vsub.f32 %v3981_v40, %v2428_v43  ;;  %v2431_v48 = vmul.f32 %v2429_v47, %v2429_v47  ;;  %v2447_v63 = vmul.f32 %v2825_v19, %v2429_v47 }
 0xf3a   :  { %v2433_v46 = vsel %vm42_vm0, %v2431_v48, 0.0  ;;  %v2432_v50 = vmul.f32 %v2430_v45, %v2430_v45  ;;  %v2448_v4 = vmul.f32 %v2825_v19, %v2430_v45 }
 0xf3b   :  { %2434 = vadd.xlane.f32.xlu0 %v2433_v46 }
 0xf3c   :  { %v2436_v51 = vsel %vm42_vm0, %v2432_v50, 0.0 }
 0xf3f   :  { %2437 = vadd.xlane.f32.xlu0 %v2436_v51 }
 0xfc8   :  { %v2435_v1 = vpop.xlane.xlu0 %2434 }
 0xfc9   :  { %v2439_v60 = vmul.f32 0.032258064, %v2435_v1 }
 0xfcb   :  { %3320 = vrsqrt.f32 %v2439_v60  ;;  %vm2451_vm14 = vcmp.eq.f32.partialorder %v2439_v60, inf  ;;  %v2454_v8 = vand.u32 2147483648, %v2439_v60  ;;  %vm2453_vm15 = vcmp.eq.f32.partialorder %v2439_v60, 0.0 }
 0xfcc   :  { %v2438_v3 = vpop.xlane.xlu0 %2437 }
 0xfcd   :  { %v2440_v5 = vmul.f32 0.032258064, %v2438_v3 }
 0xfcf   :  { %3322 = vrsqrt.f32 %v2440_v5  ;;  %vm2458_vm1 = vcmp.eq.f32.partialorder %v2440_v5, inf  ;;  %v2461_v14 = vand.u32 2147483648, %v2440_v5  ;;  %vm2460_vm2 = vcmp.eq.f32.partialorder %v2440_v5, 0.0 }
 0xfd5   :  { %v3321_v59 = vpop.eup %3320 }
 0xfd6   :  { %v2450_v62 = vmul.f32 %v3321_v59, %v2439_v60 }
 0xfd8   :  { %v2452_v10 = vsel %vm2451_vm14, %v2439_v60, %v2450_v62  ;;  %v2709_v62 = vlaneseq }
 0xfd9   :  { %v3323_v11 = vpop.eup %3322  ;;  %v2455_v7 = vsel %vm2453_vm15, %v2454_v8, %v2452_v10 }
 0xfda   :  { %v2463_v9 = vadd.f32 1e-06, %v2455_v7  ;;  %v2457_v13 = vmul.f32 %v3323_v11, %v2440_v5  ;;  %v2710_v7 = vshrl.u32 %v2709_v62, 7 }
 0xfdc   :  { %3324 = vrcp.f32 %v2463_v9  ;;  %v2459_v16 = vsel %vm2458_vm1, %v2440_v5, %v2457_v13  ;;  %v3363_v5 = vmov 1983009808  }
 0xfdd   :  { %v2462_v17 = vsel %vm2460_vm2, %v2461_v14, %v2459_v16  ;;  %v2707_v59 = vunpack.c.l.s4 %v3363_v5 }
 0xfde   :  { %v2464_v18 = vadd.f32 1e-06, %v2462_v17 }
 0xfdf   :  { %v2708_v11 = vunpack.c.0.s8 %v2707_v59 }
 0xfe0   :  { %3326 = vrcp.f32 %v2464_v18 }
 0xfe1   :  { %v2711_v19 = vsub.s32 %v2708_v11, %v2710_v7 }
 0xfe6   :  { %v3325_v20 = vpop.eup %3324 }
 0xfe7   :  { %v2466_v22 = vmul.f32 %v3325_v20, %v2447_v63 }
 0xfe9   :  { %v2475_v27 = vadd.f32 %v2826_v24, %v2466_v22 }
 0xfea   :  { %v3327_v23 = vpop.eup %3326 }
 0xfeb   :  { %v2468_v25 = vmul.f32 %v3327_v23, %v2448_v4 }
 0xfed   :  { %v2476_v28 = vadd.f32 %v2826_v24, %v2468_v25 }
 0xfef   :  { %v2482_v29 = vpack.c.bf16 %v2476_v28, %v2475_v27 }
 0xff1   :  { %3166 = vmatmul.mubr.msk.bf16.vlgmr.msra.gmra.mrb[76].mxu1 %vm42_vm0, %v2482_v29 }
0x10c4   :  { %v2538_v26 = vpop.f32.mrb[76].mxu1 }
0x10c5   :  { %v2539_v21 = vadd.f32 %v2827_v54, %v2538_v26  ;;  %v3167_v31 = vpop.f32.mrb[77].mxu1 }
0x10c6   :  { %v2541_v32 = vpop.f32.mrb[78].mxu1 }
0x10c7   :  { %v2542_v34 = vadd.f32 %v2827_v54, %v2541_v32  ;;  %v3168_v35 = vpop.f32.mrb[79].mxu1  ;;  %v2545_v0 = vmax.f32 %v2539_v21, 0.0 }
0x10c9   :  { %v2546_v61 = vmax.f32 %v2542_v34, 0.0 }
0x10cb   :  { %v2556_v2 = vpack.c.bf16 %v2546_v61, %v2545_v0 }
0x10cd   :  { %3178 = vmatmul.mubr.msk.bf16.vlgmr.msra.gmra.mrb[72].mxu0 %vm2587_vm3, %v2556_v2 }
0x11a0   :  { %v2625_v30 = vpop.f32.mrb[72].mxu0 }
0x11a1   :  { %v2626_v56 = vadd.f32 %v2831_v15, %v2625_v30  ;;  %v3179_v52 = vpop.f32.mrb[73].mxu0 }
0x11a2   :  { %v2628_v36 = vpop.f32.mrb[74].mxu0 }
0x11a3   :  { %v2632_v38 = vadd.f32 %v2626_v56, %v3978_v37  ;;  %v2629_v39 = vadd.f32 %v2831_v15, %v2628_v36  ;;  %v3180_v41 = vpop.f32.mrb[75].mxu0 }
0x11a5   :  { %v2633_v42 = vadd.f32 %v2629_v39, %v3981_v40  ;;  %v2672_v6 = vrot.slane %v2632_v38, 6  ;;  %v2636_v44 = vrot.slane %v2632_v38, 1  ;;  %v2664_v33 = vrot.slane %v2632_v38, 5 }
0x11a6   :  { %v2644_v43 = vrot.slane %v2632_v38, 2  ;;  %v2652_v46 = vrot.slane %v2632_v38, 3  ;;  %v2680_v51 = vrot.slane %v2632_v38, 7  ;;  %v2660_v14 = vrot.slane %v2632_v38, 4 }
0x11a7   :  { %2674 = vrot.lane.b32.xlu1 %v2672_v6, %s3358_s1  ;;  %2638 = vrot.lane.b32.xlu0 %v2636_v44, %s3362_s4  ;;  %v2665_v47 = vrot.slane %v2633_v42, 5  ;;  %v2645_v45 = vrot.slane %v2633_v42, 2  ;;  %v2673_v37 = vrot.slane %v2633_v42, 6  ;;  %v2637_v48 = vrot.slane %v2633_v42, 1 }
0x11a8   :  { %v2653_v40 = vrot.slane %v2633_v42, 3  ;;  %v2681_v50 = vrot.slane %v2633_v42, 7  ;;  %v2661_v9 = vrot.slane %v2633_v42, 4 }
0x11ab   :  { %2666 = vrot.lane.b32.xlu0 %v2664_v33, %s3362_s4  ;;  %2668 = vrot.lane.b32.xlu1 %v2665_v47, %s3362_s4 }
0x11af   :  { %2646 = vrot.lane.b32.xlu0 %v2644_v43, %s3358_s1  ;;  %2648 = vrot.lane.b32.xlu1 %v2645_v45, %s3358_s1 }
0x11b3   :  { %2676 = vrot.lane.b32.xlu1 %v2673_v37, %s3358_s1  ;;  %2640 = vrot.lane.b32.xlu0 %v2637_v48, %s3362_s4 }
0x11b7   :  { %2656 = vrot.lane.b32.xlu1 %v2653_v40, %s3357_s14  ;;  %2654 = vrot.lane.b32.xlu0 %v2652_v46, %s3357_s14 }
0x11bb   :  { %2684 = vrot.lane.b32.xlu1 %v2681_v50, %s3357_s14 }
0x11bf   :  { %2682 = vrot.lane.b32.xlu1 %v2680_v51, %s3357_s14  ;;  %s2742_s14 = sshll.u32 %s3364_s5, 4  ;;  %s2743_s14 = int_to_ptr.vmem [resolvable:$true] %s2742_s14 }
0x11c0   :  { %s3328_s1 = scalar_lea.vmem %s2743_s14, 64  ;;  %p3333_p1 = scmp.lt.s32.totalorder %s2743_s14, %s2743_s14 }
0x11c1   :  { %p3329_p0 = scmp.ne.s32.totalorder %s2743_s14, %s3328_s1  ;;  %p3334_p2 = scmp.lt.s32.totalorder %s3328_s1, %s3328_s1 }
0x11c3   :  { %p3335_p3 = por %p3334_p2, %p3333_p1 }
0x11c5   :  { %p3336_p4 = pnand %p3335_p3, %p3329_p0 }
0x1219   :  { %v2675_v53 = vpop.permute.xlu1 %2674  ;;  %v2639_v55 = vpop.permute.xlu0 %2638 }
0x121a   :  { %v2688_v25 = vsel %vm42_vm0, %v2632_v38, %v2639_v55 }
0x121d   :  { %v2667_v57 = vpop.permute.xlu0 %2666  ;;  %v2669_v58 = vpop.permute.xlu1 %2668 }
0x121e   :  { %v2696_v16 = vsel %vm42_vm0, %v2661_v9, %v2669_v58  ;;  %v2695_v63 = vsel %vm42_vm0, %v2660_v14, %v2667_v57 }
0x121f   :  { %v2697_v29 = vsel %vm2587_vm3, %v2695_v63, %v2675_v53 }
0x1221   :  { %v2647_v1 = vpop.permute.xlu0 %2646  ;;  %v2649_v60 = vpop.permute.xlu1 %2648 }
0x1222   :  { %v2690_v27 = vsel %vm2587_vm3, %v2688_v25, %v2647_v1 }
0x1225   :  { %v2677_v3 = vpop.permute.xlu1 %2676  ;;  %v2641_v8 = vpop.permute.xlu0 %2640 }
0x1226   :  { %v2689_v13 = vsel %vm42_vm0, %v2633_v42, %v2641_v8  ;;  %v2698_v17 = vsel %vm2587_vm3, %v2696_v16, %v2677_v3  ;;  %vm2732_vm0 = vcmask 1047559  }
0x1227   :  { %v2691_v18 = vsel %vm2587_vm3, %v2689_v13, %v2649_v60 }
0x1229   :  { %v2657_v10 = vpop.permute.xlu1 %2656  ;;  %v2655_v23 = vpop.permute.xlu0 %2654 }
0x122a   :  { %v2694_v4 = vsel %vm2692_vm4, %v2691_v18, %v2657_v10  ;;  %v2693_v49 = vsel %vm2692_vm4, %v2690_v27, %v2655_v23 }
0x122d   :  { %v2685_v20 = vpop.permute.xlu1 %2684 }
0x122e   :  { %v2700_v22 = vsel %vm2692_vm4, %v2698_v17, %v2685_v20 }
0x122f   :  { %v2713_v24 = vcombine.low %v2694_v4, %v2700_v22 }
0x1231   :  { %v2720_v28 = vrot.slane %v2713_v24, %v2711_v19  ;;  %v2683_v12 = vpop.permute.xlu1 %2682 }
0x1232   :  { %v2699_v54 = vsel %vm2692_vm4, %v2697_v29, %v2683_v12 }
0x1233   :  { %v2705_v26 = vcombine.low %v2693_v49, %v2699_v54  ;;  %v2725_v21 = vrot.slane %v2720_v28, 7 }
0x1235   :  { %v2712_v31 = vrot.slane %v2705_v26, %v2711_v19 }
0x1237   :  { %v2727_v32 = vsel %vm2726_vm5, %v2725_v21, %v2712_v31 }
0x1238   :  { %v2729_v34 = vsel %vm2728_vm6, %v2725_v21, %v2727_v32 }
0x1239   :  { %v2731_v35 = vsel %vm2730_vm7, %v2725_v21, %v2729_v34 }
0x123a   :  { %v2733_v0 = vsel %vm2732_vm0, %v2725_v21, %v2731_v35 }
0x123b   :  { %2735 = vst [vmem:[#allocation2] sm:$0xf] %v2733_v0 }
0x123c   :  { %3339 = shalt.err (!%p3336_p4)
}
0x123d   :  { %s3340_s28 = scalar_lea.hbm %s4067_s6, 64 }
0x123e   :  { %p3341_p5 = scmp.ne.s32.totalorder %s4067_s6, %s3340_s28  ;;  %p3344_p6 = scmp.lt.u32.totalorder %s3340_s28, %s4067_s6 }
0x1240   :  { %p3346_p7 = pnand %p3344_p6, %p3341_p5 }
0x1242   :  { %3349 = shalt.err (!%p3346_p7)
}
0x1243   :  { %2745 = dma.vmem_to_hbm [thread:$0]  %s2743_s14, 64, %s4067_s6, [#allocation3]  }
0x1244   :  { %3350 = dma.done.wait [#allocation3], 64  }
0x1245   :  { %3351 = vsyncadd [#allocation3], 4294967232 }
0x1246   :  { %2749 = vsyncpa [#allocation3], 1 }

</bundles_post_ra>
